<compile_context>
chip_gen: v7x
topology: tpu7x:2x2x1
jax: 0.10.0
libtpu: 0.0.40
codegen_flags: <defaults>
</compile_context>

<pallas_src>
import jax
import jax.numpy as jnp
from jax.experimental import pallas as pl
from jax.experimental.pallas import tpu as pltpu


def _round_up(x, m):
    return (x + m - 1) // m * m


def _make_fused_kernel(n_taps, cmid_p, nq, shifts):
    """Fused conv1(+post1) -> conv2(+post2) kernel, single program, all in VMEM."""

    def kernel(p1t_ref, w1t_ref, b1_ref, mask_ref, w2t_ref, b2_ref, out_ref, a_ref):
        # conv1 as ONE matmul:  (Cmid_p, K1) @ (K1, NP) -> (Cmid_p, NP)
        raw1 = jnp.dot(w1t_ref[...], p1t_ref[...],
                       preferred_element_type=jnp.float32)
        # fused post-op (relu(x-10)+1) and the conv2 zero-padding mask
        v6p = (jnp.maximum(raw1 + b1_ref[...] - 10.0, 0.0) + 1.0) * mask_ref[...]

        # Build conv2 im2col LHS (transposed): rows = (tap, channel), cols = output pos.
        # Each tap is a contiguous lane-slice of v6p (strided-flat spatial layout).
        for t in range(n_taps):
            s = shifts[t]
            a_ref[pl.ds(t * cmid_p, cmid_p), :] = v6p[:, s:s + nq]

        # conv2 as ONE matmul:  (Cout, n_taps*Cmid_p) @ (n_taps*Cmid_p, NQ) -> (Cout, NQ)
        raw2 = jnp.dot(w2t_ref[...], a_ref[...],
                       preferred_element_type=jnp.float32)
        out_ref[...] = jnp.maximum(raw2 + b2_ref[...] - 11.0, 0.0)

    return kernel


def _fused_two_convs_single(x_chw, w1, b1, w2, b2):
    """x_chw: (Cin, H, W). Returns relu(conv2(relu(conv1(x)-10)+1)-11) as (Cout, H, W)."""
    Cin, H, W = x_chw.shape
    Cmid, Cin_w, KH, KW = w1.shape
    Cout = w2.shape[0]
    assert Cin == Cin_w and w2.shape[1] == Cmid
    pad = KH // 2
    Hp, Wp = H + 2 * pad, W + 2 * pad

    f32 = jnp.float32
    Cmid_p = _round_up(Cmid, 8)                          # 24: sublane-aligned channel blocks
    nq = _round_up((H - 1) * Wp + W, 128)                # 384: lane-dense output columns
    max_shift = (KH - 1) * Wp + (KW - 1)                 # 84
    np_ = _round_up(max(Hp * Wp, max_shift + nq), 128)   # 512: padded flat spatial width

    # ---- conv1 im2col (transposed, strided-flat): rows=(kh,kw,ci), cols=hp*Wp+wp ----
    xp = jnp.pad(x_chw.astype(f32), ((0, 0), (2 * pad, 2 * pad), (2 * pad, 2 * pad)))
    blocks = [xp[:, kh:kh + Hp, kw:kw + Wp].reshape(Cin, Hp * Wp)
              for kh in range(KH) for kw in range(KW)]
    p1t = jnp.concatenate(blocks, axis=0)                          # (KH*KW*Cin, Hp*Wp)
    p1t = jnp.pad(p1t, ((0, 0), (0, np_ - Hp * Wp)))               # (75, 512)

    # ---- weights / biases in matmul layout (channel dim zero-padded to Cmid_p) ----
    w1t = jnp.transpose(w1, (0, 2, 3, 1)).reshape(Cmid, KH * KW * Cin).astype(f32)
    w1t = jnp.pad(w1t, ((0, Cmid_p - Cmid), (0, 0)))               # (24, 75)
    b1c = jnp.pad(b1.astype(f32), (0, Cmid_p - Cmid)).reshape(Cmid_p, 1)

    w2r = jnp.transpose(w2, (0, 2, 3, 1)).astype(f32)              # (Cout, KH, KW, Cmid)
    w2r = jnp.pad(w2r, ((0, 0), (0, 0), (0, 0), (0, Cmid_p - Cmid)))
    w2t = w2r.reshape(Cout, KH * KW * Cmid_p)                      # (50, 600)
    b2c = b2.astype(f32).reshape(Cout, 1)

    # ---- validity mask: zeroes the conv2 'same' padding border and the lane tail ----
    idx = jnp.arange(np_)
    hp_i, wp_i = idx // Wp, idx % Wp
    valid = (hp_i >= pad) & (hp_i < pad + H) & (wp_i >= pad) & (wp_i < pad + W)
    mask = valid.astype(f32).reshape(1, np_)                       # (1, 512)

    shifts = tuple(kh * Wp + kw for kh in range(KH) for kw in range(KW))
    kernel = _make_fused_kernel(KH * KW, Cmid_p, nq, shifts)

    vmem = pl.BlockSpec(memory_space=pltpu.MemorySpace.VMEM)
    out_flat = pl.pallas_call(
        kernel,
        out_shape=jax.ShapeDtypeStruct((Cout, nq), f32),
        in_specs=[vmem] * 6,
        out_specs=vmem,
        scratch_shapes=[pltpu.VMEM((KH * KW * Cmid_p, nq), f32)],  # conv2 im2col (600, 384)
    )(p1t, w1t, b1c, mask, w2t, b2c)

    # Column q = h*Wp + w holds output pixel (h, w); drop the stride gaps / lane padding.
    out_img = out_flat[:, :H * Wp].reshape(Cout, H, Wp)[:, :, :W]  # (Cout, H, W)
    return out_img


@jax.jit
def model_forward(x, params):
    w1, b1, w2, b2 = params
    outs = [_fused_two_convs_single(x[n], w1, b1, w2, b2) for n in range(x.shape[0])]
    # TODO(synk): the original forward applies conv2 again to v9 (50 channels), but
    # conv2 expects 20 input channels, so the PyTorch module itself raises at v10;
    # we return v9, the last well-defined intermediate.
    return jnp.stack(outs, axis=0)                                 # NCHW


def ref_forward(x, params):
    """Pure-JAX reference for the same (well-defined) portion of the forward."""
    w1, b1, w2, b2 = params

    def conv(x, w, b):
        y = jax.lax.conv_general_dilated(
            x, w, window_strides=(1, 1), padding=((2, 2), (2, 2)),
            dimension_numbers=("NCHW", "OIHW", "NCHW"),
            precision=jax.lax.Precision.HIGHEST)
        return y + b.reshape(1, -1, 1, 1)

    v6 = jnp.maximum(conv(x, w1, b1) - 10.0, 0.0) + 1.0
    v9 = jnp.maximum(conv(v6, w2, b2) - 11.0, 0.0)
    return v9


if __name__ == "__main__":
    key = jax.random.PRNGKey(0)
    k_x, k_w1, k_b1, k_w2, k_b2 = jax.random.split(key, 5)

    # Small shapes consistent with the module: batch=1, Cin=3, spatial=16.
    x = jax.random.normal(k_x, (1, 3, 16, 16), dtype=jnp.float32)

    # Deterministic parameters (Conv2d(3,20,5) and Conv2d(20,50,5)).
    w1 = jax.random.normal(k_w1, (20, 3, 5, 5), dtype=jnp.float32)
    b1 = 0.1 * jax.random.normal(k_b1, (20,), dtype=jnp.float32)
    w2 = 0.2 * jax.random.normal(k_w2, (50, 20, 5, 5), dtype=jnp.float32)
    b2 = 0.1 * jax.random.normal(k_b2, (50,), dtype=jnp.float32)
    params = (w1, b1, w2, b2)

    out = jax.block_until_ready(model_forward(x, params))
    ref = jax.block_until_ready(ref_forward(x, params))

    assert out.shape == (1, 50, 16, 16), out.shape
    assert jnp.allclose(out, ref, rtol=5e-2, atol=5e-1), (
        float(jnp.max(jnp.abs(out - ref))))

    print("KERNEL_OK")
</pallas_src>

<mosaic_0001>
module attributes {stable_mosaic.version = 11 : i64} {
  func.func @kernel(%arg0: memref<75x512xf32, #tpu.memory_space<vmem>>, %arg1: memref<24x75xf32, #tpu.memory_space<vmem>>, %arg2: memref<24x1xf32, #tpu.memory_space<vmem>>, %arg3: memref<1x512xf32, #tpu.memory_space<vmem>>, %arg4: memref<50x600xf32, #tpu.memory_space<vmem>>, %arg5: memref<50x1xf32, #tpu.memory_space<vmem>>, %arg6: memref<50x384xf32, #tpu.memory_space<vmem>>, %arg7: memref<600x384xf32, #tpu.memory_space<vmem>>) attributes {dimension_semantics = [], scalar_prefetch = 0 : i64, scratch_operands = 1 : i64, tpu.core_type = #tpu.core_type<tc>} {
    %c0 = arith.constant 0 : index
    %c0_0 = arith.constant 0 : index
    %0 = vector.load %arg1[%c0, %c0_0] : memref<24x75xf32, #tpu.memory_space<vmem>>, vector<24x75xf32>
    %c0_1 = arith.constant 0 : index
    %c0_2 = arith.constant 0 : index
    %1 = vector.load %arg0[%c0_1, %c0_2] : memref<75x512xf32, #tpu.memory_space<vmem>>, vector<75x512xf32>
    %cst = arith.constant dense<0.000000e+00> : vector<24x512xf32>
    %2 = tpu.matmul %0, %1, %cst {dimension_numbers = #tpu.dot_dimension_numbers<[1], [0], [0], [1], [0, 0, 1, 1], [], []>} : vector<24x75xf32>, vector<75x512xf32>, vector<24x512xf32> -> vector<24x512xf32>
    %c0_3 = arith.constant 0 : index
    %c0_4 = arith.constant 0 : index
    %3 = vector.load %arg2[%c0_3, %c0_4] : memref<24x1xf32, #tpu.memory_space<vmem>>, vector<24x1xf32>
    %4 = vector.broadcast %3 : vector<24x1xf32> to vector<24x512xf32>
    %5 = arith.addf %2, %4 : vector<24x512xf32>
    %cst_5 = arith.constant 1.000000e+01 : f32
    %6 = vector.broadcast %cst_5 : f32 to vector<24x512xf32>
    %7 = arith.subf %5, %6 : vector<24x512xf32>
    %cst_6 = arith.constant 0.000000e+00 : f32
    %8 = vector.broadcast %cst_6 : f32 to vector<24x512xf32>
    %9 = arith.maximumf %7, %8 : vector<24x512xf32>
    %cst_7 = arith.constant 1.000000e+00 : f32
    %10 = vector.broadcast %cst_7 : f32 to vector<24x512xf32>
    %11 = arith.addf %9, %10 : vector<24x512xf32>
    %c0_8 = arith.constant 0 : index
    %c0_9 = arith.constant 0 : index
    %12 = vector.load %arg3[%c0_8, %c0_9] : memref<1x512xf32, #tpu.memory_space<vmem>>, vector<1x512xf32>
    %13 = vector.broadcast %12 : vector<1x512xf32> to vector<24x512xf32>
    %14 = arith.mulf %11, %13 : vector<24x512xf32>
    %15 = vector.extract_strided_slice %14 {offsets = [0, 0], sizes = [24, 384], strides = [1, 1]} : vector<24x512xf32> to vector<24x384xf32>
    %c0_10 = arith.constant 0 : index
    %c0_11 = arith.constant 0 : index
    %16 = vector.load %arg7[%c0_10, %c0_11] : memref<600x384xf32, #tpu.memory_space<vmem>>, vector<24x384xf32>
    tpu.vector_store %arg7[%c0_10, %c0_11], %15 {strides = array<i32>} : memref<600x384xf32, #tpu.memory_space<vmem>>, vector<24x384xf32>,
    %17 = vector.extract_strided_slice %14 {offsets = [0, 1], sizes = [24, 384], strides = [1, 1]} : vector<24x512xf32> to vector<24x384xf32>
    %c24 = arith.constant 24 : index
    %c0_12 = arith.constant 0 : index
    %18 = vector.load %arg7[%c24, %c0_12] : memref<600x384xf32, #tpu.memory_space<vmem>>, vector<24x384xf32>
    tpu.vector_store %arg7[%c24, %c0_12], %17 {strides = array<i32>} : memref<600x384xf32, #tpu.memory_space<vmem>>, vector<24x384xf32>,
    %19 = vector.extract_strided_slice %14 {offsets = [0, 2], sizes = [24, 384], strides = [1, 1]} : vector<24x512xf32> to vector<24x384xf32>
    %c48 = arith.constant 48 : index
    %c0_13 = arith.constant 0 : index
    %20 = vector.load %arg7[%c48, %c0_13] : memref<600x384xf32, #tpu.memory_space<vmem>>, vector<24x384xf32>
    tpu.vector_store %arg7[%c48, %c0_13], %19 {strides = array<i32>} : memref<600x384xf32, #tpu.memory_space<vmem>>, vector<24x384xf32>,
    %21 = vector.extract_strided_slice %14 {offsets = [0, 3], sizes = [24, 384], strides = [1, 1]} : vector<24x512xf32> to vector<24x384xf32>
    %c72 = arith.constant 72 : index
    %c0_14 = arith.constant 0 : index
    %22 = vector.load %arg7[%c72, %c0_14] : memref<600x384xf32, #tpu.memory_space<vmem>>, vector<24x384xf32>
    tpu.vector_store %arg7[%c72, %c0_14], %21 {strides = array<i32>} : memref<600x384xf32, #tpu.memory_space<vmem>>, vector<24x384xf32>,
    %23 = vector.extract_strided_slice %14 {offsets = [0, 4], sizes = [24, 384], strides = [1, 1]} : vector<24x512xf32> to vector<24x384xf32>
    %c96 = arith.constant 96 : index
    %c0_15 = arith.constant 0 : index
    %24 = vector.load %arg7[%c96, %c0_15] : memref<600x384xf32, #tpu.memory_space<vmem>>, vector<24x384xf32>
    tpu.vector_store %arg7[%c96, %c0_15], %23 {strides = array<i32>} : memref<600x384xf32, #tpu.memory_space<vmem>>, vector<24x384xf32>,
    %25 = vector.extract_strided_slice %14 {offsets = [0, 20], sizes = [24, 384], strides = [1, 1]} : vector<24x512xf32> to vector<24x384xf32>
    %c120 = arith.constant 120 : index
    %c0_16 = arith.constant 0 : index
    %26 = vector.load %arg7[%c120, %c0_16] : memref<600x384xf32, #tpu.memory_space<vmem>>, vector<24x384xf32>
    tpu.vector_store %arg7[%c120, %c0_16], %25 {strides = array<i32>} : memref<600x384xf32, #tpu.memory_space<vmem>>, vector<24x384xf32>,
    %27 = vector.extract_strided_slice %14 {offsets = [0, 21], sizes = [24, 384], strides = [1, 1]} : vector<24x512xf32> to vector<24x384xf32>
    %c144 = arith.constant 144 : index
    %c0_17 = arith.constant 0 : index
    %28 = vector.load %arg7[%c144, %c0_17] : memref<600x384xf32, #tpu.memory_space<vmem>>, vector<24x384xf32>
    tpu.vector_store %arg7[%c144, %c0_17], %27 {strides = array<i32>} : memref<600x384xf32, #tpu.memory_space<vmem>>, vector<24x384xf32>,
    %29 = vector.extract_strided_slice %14 {offsets = [0, 22], sizes = [24, 384], strides = [1, 1]} : vector<24x512xf32> to vector<24x384xf32>
    %c168 = arith.constant 168 : index
    %c0_18 = arith.constant 0 : index
    %30 = vector.load %arg7[%c168, %c0_18] : memref<600x384xf32, #tpu.memory_space<vmem>>, vector<24x384xf32>
    tpu.vector_store %arg7[%c168, %c0_18], %29 {strides = array<i32>} : memref<600x384xf32, #tpu.memory_space<vmem>>, vector<24x384xf32>,
    %31 = vector.extract_strided_slice %14 {offsets = [0, 23], sizes = [24, 384], strides = [1, 1]} : vector<24x512xf32> to vector<24x384xf32>
    %c192 = arith.constant 192 : index
    %c0_19 = arith.constant 0 : index
    %32 = vector.load %arg7[%c192, %c0_19] : memref<600x384xf32, #tpu.memory_space<vmem>>, vector<24x384xf32>
    tpu.vector_store %arg7[%c192, %c0_19], %31 {strides = array<i32>} : memref<600x384xf32, #tpu.memory_space<vmem>>, vector<24x384xf32>,
    %33 = vector.extract_strided_slice %14 {offsets = [0, 24], sizes = [24, 384], strides = [1, 1]} : vector<24x512xf32> to vector<24x384xf32>
    %c216 = arith.constant 216 : index
    %c0_20 = arith.constant 0 : index
    %34 = vector.load %arg7[%c216, %c0_20] : memref<600x384xf32, #tpu.memory_space<vmem>>, vector<24x384xf32>
    tpu.vector_store %arg7[%c216, %c0_20], %33 {strides = array<i32>} : memref<600x384xf32, #tpu.memory_space<vmem>>, vector<24x384xf32>,
    %35 = vector.extract_strided_slice %14 {offsets = [0, 40], sizes = [24, 384], strides = [1, 1]} : vector<24x512xf32> to vector<24x384xf32>
    %c240 = arith.constant 240 : index
    %c0_21 = arith.constant 0 : index
    %36 = vector.load %arg7[%c240, %c0_21] : memref<600x384xf32, #tpu.memory_space<vmem>>, vector<24x384xf32>
    tpu.vector_store %arg7[%c240, %c0_21], %35 {strides = array<i32>} : memref<600x384xf32, #tpu.memory_space<vmem>>, vector<24x384xf32>,
    %37 = vector.extract_strided_slice %14 {offsets = [0, 41], sizes = [24, 384], strides = [1, 1]} : vector<24x512xf32> to vector<24x384xf32>
    %c264 = arith.constant 264 : index
    %c0_22 = arith.constant 0 : index
    %38 = vector.load %arg7[%c264, %c0_22] : memref<600x384xf32, #tpu.memory_space<vmem>>, vector<24x384xf32>
    tpu.vector_store %arg7[%c264, %c0_22], %37 {strides = array<i32>} : memref<600x384xf32, #tpu.memory_space<vmem>>, vector<24x384xf32>,
    %39 = vector.extract_strided_slice %14 {offsets = [0, 42], sizes = [24, 384], strides = [1, 1]} : vector<24x512xf32> to vector<24x384xf32>
    %c288 = arith.constant 288 : index
    %c0_23 = arith.constant 0 : index
    %40 = vector.load %arg7[%c288, %c0_23] : memref<600x384xf32, #tpu.memory_space<vmem>>, vector<24x384xf32>
    tpu.vector_store %arg7[%c288, %c0_23], %39 {strides = array<i32>} : memref<600x384xf32, #tpu.memory_space<vmem>>, vector<24x384xf32>,
    %41 = vector.extract_strided_slice %14 {offsets = [0, 43], sizes = [24, 384], strides = [1, 1]} : vector<24x512xf32> to vector<24x384xf32>
    %c312 = arith.constant 312 : index
    %c0_24 = arith.constant 0 : index
    %42 = vector.load %arg7[%c312, %c0_24] : memref<600x384xf32, #tpu.memory_space<vmem>>, vector<24x384xf32>
    tpu.vector_store %arg7[%c312, %c0_24], %41 {strides = array<i32>} : memref<600x384xf32, #tpu.memory_space<vmem>>, vector<24x384xf32>,
    %43 = vector.extract_strided_slice %14 {offsets = [0, 44], sizes = [24, 384], strides = [1, 1]} : vector<24x512xf32> to vector<24x384xf32>
    %c336 = arith.constant 336 : index
    %c0_25 = arith.constant 0 : index
    %44 = vector.load %arg7[%c336, %c0_25] : memref<600x384xf32, #tpu.memory_space<vmem>>, vector<24x384xf32>
    tpu.vector_store %arg7[%c336, %c0_25], %43 {strides = array<i32>} : memref<600x384xf32, #tpu.memory_space<vmem>>, vector<24x384xf32>,
    %45 = vector.extract_strided_slice %14 {offsets = [0, 60], sizes = [24, 384], strides = [1, 1]} : vector<24x512xf32> to vector<24x384xf32>
    %c360 = arith.constant 360 : index
    %c0_26 = arith.constant 0 : index
    %46 = vector.load %arg7[%c360, %c0_26] : memref<600x384xf32, #tpu.memory_space<vmem>>, vector<24x384xf32>
    tpu.vector_store %arg7[%c360, %c0_26], %45 {strides = array<i32>} : memref<600x384xf32, #tpu.memory_space<vmem>>, vector<24x384xf32>,
    %47 = vector.extract_strided_slice %14 {offsets = [0, 61], sizes = [24, 384], strides = [1, 1]} : vector<24x512xf32> to vector<24x384xf32>
    %c384 = arith.constant 384 : index
    %c0_27 = arith.constant 0 : index
    %48 = vector.load %arg7[%c384, %c0_27] : memref<600x384xf32, #tpu.memory_space<vmem>>, vector<24x384xf32>
    tpu.vector_store %arg7[%c384, %c0_27], %47 {strides = array<i32>} : memref<600x384xf32, #tpu.memory_space<vmem>>, vector<24x384xf32>,
    %49 = vector.extract_strided_slice %14 {offsets = [0, 62], sizes = [24, 384], strides = [1, 1]} : vector<24x512xf32> to vector<24x384xf32>
    %c408 = arith.constant 408 : index
    %c0_28 = arith.constant 0 : index
    %50 = vector.load %arg7[%c408, %c0_28] : memref<600x384xf32, #tpu.memory_space<vmem>>, vector<24x384xf32>
    tpu.vector_store %arg7[%c408, %c0_28], %49 {strides = array<i32>} : memref<600x384xf32, #tpu.memory_space<vmem>>, vector<24x384xf32>,
    %51 = vector.extract_strided_slice %14 {offsets = [0, 63], sizes = [24, 384], strides = [1, 1]} : vector<24x512xf32> to vector<24x384xf32>
    %c432 = arith.constant 432 : index
    %c0_29 = arith.constant 0 : index
    %52 = vector.load %arg7[%c432, %c0_29] : memref<600x384xf32, #tpu.memory_space<vmem>>, vector<24x384xf32>
    tpu.vector_store %arg7[%c432, %c0_29], %51 {strides = array<i32>} : memref<600x384xf32, #tpu.memory_space<vmem>>, vector<24x384xf32>,
    %53 = vector.extract_strided_slice %14 {offsets = [0, 64], sizes = [24, 384], strides = [1, 1]} : vector<24x512xf32> to vector<24x384xf32>
    %c456 = arith.constant 456 : index
    %c0_30 = arith.constant 0 : index
    %54 = vector.load %arg7[%c456, %c0_30] : memref<600x384xf32, #tpu.memory_space<vmem>>, vector<24x384xf32>
    tpu.vector_store %arg7[%c456, %c0_30], %53 {strides = array<i32>} : memref<600x384xf32, #tpu.memory_space<vmem>>, vector<24x384xf32>,
    %55 = vector.extract_strided_slice %14 {offsets = [0, 80], sizes = [24, 384], strides = [1, 1]} : vector<24x512xf32> to vector<24x384xf32>
    %c480 = arith.constant 480 : index
    %c0_31 = arith.constant 0 : index
    %56 = vector.load %arg7[%c480, %c0_31] : memref<600x384xf32, #tpu.memory_space<vmem>>, vector<24x384xf32>
    tpu.vector_store %arg7[%c480, %c0_31], %55 {strides = array<i32>} : memref<600x384xf32, #tpu.memory_space<vmem>>, vector<24x384xf32>,
    %57 = vector.extract_strided_slice %14 {offsets = [0, 81], sizes = [24, 384], strides = [1, 1]} : vector<24x512xf32> to vector<24x384xf32>
    %c504 = arith.constant 504 : index
    %c0_32 = arith.constant 0 : index
    %58 = vector.load %arg7[%c504, %c0_32] : memref<600x384xf32, #tpu.memory_space<vmem>>, vector<24x384xf32>
    tpu.vector_store %arg7[%c504, %c0_32], %57 {strides = array<i32>} : memref<600x384xf32, #tpu.memory_space<vmem>>, vector<24x384xf32>,
    %59 = vector.extract_strided_slice %14 {offsets = [0, 82], sizes = [24, 384], strides = [1, 1]} : vector<24x512xf32> to vector<24x384xf32>
    %c528 = arith.constant 528 : index
    %c0_33 = arith.constant 0 : index
    %60 = vector.load %arg7[%c528, %c0_33] : memref<600x384xf32, #tpu.memory_space<vmem>>, vector<24x384xf32>
    tpu.vector_store %arg7[%c528, %c0_33], %59 {strides = array<i32>} : memref<600x384xf32, #tpu.memory_space<vmem>>, vector<24x384xf32>,
    %61 = vector.extract_strided_slice %14 {offsets = [0, 83], sizes = [24, 384], strides = [1, 1]} : vector<24x512xf32> to vector<24x384xf32>
    %c552 = arith.constant 552 : index
    %c0_34 = arith.constant 0 : index
    %62 = vector.load %arg7[%c552, %c0_34] : memref<600x384xf32, #tpu.memory_space<vmem>>, vector<24x384xf32>
    tpu.vector_store %arg7[%c552, %c0_34], %61 {strides = array<i32>} : memref<600x384xf32, #tpu.memory_space<vmem>>, vector<24x384xf32>,
    %63 = vector.extract_strided_slice %14 {offsets = [0, 84], sizes = [24, 384], strides = [1, 1]} : vector<24x512xf32> to vector<24x384xf32>
    %c576 = arith.constant 576 : index
    %c0_35 = arith.constant 0 : index
    %64 = vector.load %arg7[%c576, %c0_35] : memref<600x384xf32, #tpu.memory_space<vmem>>, vector<24x384xf32>
    tpu.vector_store %arg7[%c576, %c0_35], %63 {strides = array<i32>} : memref<600x384xf32, #tpu.memory_space<vmem>>, vector<24x384xf32>,
    %c0_36 = arith.constant 0 : index
    %c0_37 = arith.constant 0 : index
    %65 = vector.load %arg4[%c0_36, %c0_37] : memref<50x600xf32, #tpu.memory_space<vmem>>, vector<50x600xf32>
    %c0_38 = arith.constant 0 : index
    %c0_39 = arith.constant 0 : index
    %66 = vector.load %arg7[%c0_38, %c0_39] : memref<600x384xf32, #tpu.memory_space<vmem>>, vector<600x384xf32>
    %cst_40 = arith.constant dense<0.000000e+00> : vector<50x384xf32>
    %67 = tpu.matmul %65, %66, %cst_40 {dimension_numbers = #tpu.dot_dimension_numbers<[1], [0], [0], [1], [0, 0, 1, 1], [], []>} : vector<50x600xf32>, vector<600x384xf32>, vector<50x384xf32> -> vector<50x384xf32>
    %c0_41 = arith.constant 0 : index
    %c0_42 = arith.constant 0 : index
    %68 = vector.load %arg5[%c0_41, %c0_42] : memref<50x1xf32, #tpu.memory_space<vmem>>, vector<50x1xf32>
    %69 = vector.broadcast %68 : vector<50x1xf32> to vector<50x384xf32>
    %70 = arith.addf %67, %69 : vector<50x384xf32>
    %cst_43 = arith.constant 1.100000e+01 : f32
    %71 = vector.broadcast %cst_43 : f32 to vector<50x384xf32>
    %72 = arith.subf %70, %71 : vector<50x384xf32>
    %cst_44 = arith.constant 0.000000e+00 : f32
    %73 = vector.broadcast %cst_44 : f32 to vector<50x384xf32>
    %74 = arith.maximumf %72, %73 : vector<50x384xf32>
    %c0_45 = arith.constant 0 : index
    %c0_46 = arith.constant 0 : index
    %75 = vector.load %arg6[%c0_45, %c0_46] : memref<50x384xf32, #tpu.memory_space<vmem>>, vector<50x384xf32>
    tpu.vector_store %arg6[%c0_45, %c0_46], %74 {strides = array<i32>} : memref<50x384xf32, #tpu.memory_space<vmem>>, vector<50x384xf32>,
    return
  }
}

</mosaic_0001>

<bundles_post_ra>
// kernel: model_forward.1
= control target key start
LH: loop header
LB: loop body
LE: loop exit
PB: predicated region body
PF: predicated region fallthrough
CT: control target
= control target key end

     0   :  { %v6246_v3 = vmov 0.0   ;;  %v3895_v8 = vmov 0   ;;  %vm94_vm0 = vcmask 1042432   ;;  %vm3896_vm1 = vmmov 1   ;;  %s3899_s17 = smov 125   ;;  %s3900_s18 = smov 124   ;;  %s6239_s0 = inlined_call_operand.vmem [shape: f32[75,512], index: 0, kind: input, shape index: {}]   ;;  %s6240_s2 = inlined_call_operand.vmem [shape: f32[24,1], index: 2, kind: input, shape index: {}]   ;;  %s6241_s1 = inlined_call_operand.vmem [shape: f32[24,75], index: 1, kind: input, shape index: {}]   ;;  %s6242_s3 = inlined_call_operand.vmem [shape: f32[1,512], index: 3, kind: input, shape index: {}]   ;;  %s6243_s4 = inlined_call_operand.vmem [shape: f32[50,600], index: 4, kind: input, shape index: {}]   ;;  %s6244_s5 = inlined_call_operand.vmem [shape: f32[50,1], index: 5, kind: input, shape index: {}]   ;;  %s6245_s6 = inlined_call_operand.vmem [shape: f32[50,384], index: 6, kind: output, shape index: {}]  }
   0x1   :  { %v27_v0 = vld [vmem:[%s6239_s0 + $0x8] sm:$0xff]  ;;  %v29_v2 = vld [vmem:[%s6239_s0 + $0x18] sm:$0xff]  ;;  %171 = vmatprep.mubr.f32.mxu0 %v6246_v3  ;;  %254 = vmatprep.mubr.f32.mxu1 %v6246_v3  ;;  %v26_v6 = vld [vmem:[%s6239_s0] sm:$0xff]  ;;  %vm84_vm3 = vcmask 613376   ;;  %s3901_s19 = smov 108   ;;  %s3902_s20 = smov 107  }
   0x2   :  { %v31_v1 = vld [vmem:[%s6239_s0 + $0x28] sm:$0xff]  ;;  %v33_v5 = vld [vmem:[%s6239_s0 + $0x38] sm:$0xff]  ;;  %v30_v7 = vld [vmem:[%s6239_s0 + $0x20] sm:$0xff]  ;;  %3189 = vset.pattern.permute.xlu0 %v3895_v8  ;;  %3190 = vset.pattern.permute.xlu1 %v3895_v8  ;;  %s3903_s21 = smov 106   ;;  %s3904_s22 = smov 105   ;;  %vm388_vm4 = vcmask 1039360  }
   0x3   :  { %v2847_v4 = vpack.c.bf16 %v31_v1, %v27_v0  ;;  %v2869_v9 = vpack.c.bf16 %v33_v5, %v29_v2  ;;  %v2849_v10 = vpack.c.bf16 %v30_v7, %v26_v6  ;;  %v28_v11 = vld [vmem:[%s6239_s0 + $0x10] sm:$0xff]  ;;  %v35_v13 = vld [vmem:[%s6239_s0 + $0x48] sm:$0xff]  ;;  %v37_v16 = vld [vmem:[%s6239_s0 + $0x58] sm:$0xff]  ;;  %v311_v6 = vlaneseq  ;;  %s3905_s23 = smov 104   ;;  %s3906_s24 = smov 46  }
   0x4   :  { %v32_v12 = vld [vmem:[%s6239_s0 + $0x30] sm:$0xff]  ;;  %v39_v15 = vld [vmem:[%s6239_s0 + $0x68] sm:$0xff]  ;;  %v41_v17 = vld [vmem:[%s6239_s0 + $0x78] sm:$0xff]  ;;  %s3907_s25 = smov 87   ;;  %s3908_s26 = smov 45   ;;  %vm440_vm5 = vcmask 1031168  }
   0x5   :  { %2848 = vmatprep.subr.bf16.mxu0 %v2847_v4  ;;  %v2871_v14 = vpack.c.bf16 %v32_v12, %v28_v11  ;;  %2870 = vmatprep.subr.bf16.mxu1 %v2869_v9  ;;  %v2851_v18 = vpack.c.bf16 %v39_v15, %v35_v13  ;;  %v2873_v19 = vpack.c.bf16 %v41_v17, %v37_v16  ;;  %v34_v20 = vld [vmem:[%s6239_s0 + $0x40] sm:$0xff]  ;;  %v36_v22 = vld [vmem:[%s6239_s0 + $0x50] sm:$0xff]  ;;  %v43_v25 = vld [vmem:[%s6239_s0 + $0x88] sm:$0xff]  ;;  %v312_v7 = vshrl.u32 %v311_v6, 7  ;;  %s3909_s27 = smov 85   ;;  %s3910_s28 = smov 44  }
   0x6   :  { %2850 = vmatpush1.bf16.msra.mxu0 %v2849_v10  ;;  %v38_v21 = vld [vmem:[%s6239_s0 + $0x60] sm:$0xff]  ;;  %v40_v24 = vld [vmem:[%s6239_s0 + $0x70] sm:$0xff]  ;;  %v47_v26 = vld [vmem:[%s6239_s0 + $0xa8] sm:$0xff]  ;;  %s3911_s29 = smov 88   ;;  %s3912_s30 = smov 67   ;;  %vm544_vm6 = vcmask 1014784  }
   0x7   :  { %2872 = vmatpush1.bf16.msra.mxu1 %v2871_v14  ;;  %v2853_v23 = vpack.c.bf16 %v38_v21, %v34_v20  ;;  %2852 = vmatprep.subr.bf16.mxu0 %v2851_v18  ;;  %v2875_v27 = vpack.c.bf16 %v40_v24, %v36_v22  ;;  %v2855_v28 = vpack.c.bf16 %v47_v26, %v43_v25  ;;  %v45_v29 = vld [vmem:[%s6239_s0 + $0x98] sm:$0xff]  ;;  %v42_v31 = vld [vmem:[%s6239_s0 + $0x80] sm:$0xff]  ;;  %v44_v34 = vld [vmem:[%s6239_s0 + $0x90] sm:$0xff]  ;;  %v313_v9 = vsub.s32 0, %v312_v7  ;;  %s3913_s7 = smov 86   ;;  %s3914_s8 = smov 66  }
   0x8   :  { %2874 = vmatprep.subr.bf16.mxu1 %v2873_v19  ;;  %v49_v30 = vld [vmem:[%s6239_s0 + $0xb8] sm:$0xff]  ;;  %v46_v33 = vld [vmem:[%s6239_s0 + $0xa0] sm:$0xff]  ;;  %v48_v35 = vld [vmem:[%s6239_s0 + $0xb0] sm:$0xff]  ;;  %v321_v12 = vsub.s32 2, %v312_v7  ;;  %v317_v13 = vsub.s32 1, %v312_v7  ;;  %v325_v17 = vsub.s32 3, %v312_v7 }
   0x9   :  { %v2877_v32 = vpack.c.bf16 %v49_v30, %v45_v29  ;;  %v2857_v36 = vpack.c.bf16 %v46_v33, %v42_v31  ;;  %v51_v37 = vld [vmem:[%s6239_s0 + $0xc8] sm:$0xff]  ;;  %v53_v39 = vld [vmem:[%s6239_s0 + $0xd8] sm:$0xff]  ;;  %v2879_v40 = vpack.c.bf16 %v48_v35, %v44_v34  ;;  %v50_v43 = vld [vmem:[%s6239_s0 + $0xc0] sm:$0xff]  ;;  %s3915_s9 = smov 47   ;;  %s3916_s10 = smov 65   ;;  %vm492_vm7 = vcmask 1022976  }
   0xa   :  { %2854 = vmatpush1.bf16.msra.mxu0 %v2853_v23  ;;  %v55_v38 = vld [vmem:[%s6239_s0 + $0xe8] sm:$0xff]  ;;  %v57_v42 = vld [vmem:[%s6239_s0 + $0xf8] sm:$0xff]  ;;  %v54_v44 = vld [vmem:[%s6239_s0 + $0xe0] sm:$0xff]  ;;  %s3918_s11 = smov 68   ;;  %s3920_s12 = smov 64   ;;  %vm596_vm8 = vcmask 883712  }
   0xb   :  { %2876 = vmatpush1.bf16.msra.mxu1 %v2875_v27  ;;  %2856 = vmatprep.subr.bf16.mxu0 %v2855_v28  ;;  %v2859_v41 = vpack.c.bf16 %v55_v38, %v51_v37  ;;  %v2881_v45 = vpack.c.bf16 %v57_v42, %v53_v39  ;;  %v52_v46 = vld [vmem:[%s6239_s0 + $0xd0] sm:$0xff]  ;;  %v59_v48 = vld [vmem:[%s6239_s0 + $0x108] sm:$0xff]  ;;  %v61_v50 = vld [vmem:[%s6239_s0 + $0x118] sm:$0xff]  ;;  %v2861_v51 = vpack.c.bf16 %v54_v44, %v50_v43  ;;  %vm648_vm9 = vcmask 875520  }
   0xc   :  { %2878 = vmatprep.subr.bf16.mxu1 %v2877_v32  ;;  %v56_v47 = vld [vmem:[%s6239_s0 + $0xf0] sm:$0xff]  ;;  %v63_v49 = vld [vmem:[%s6239_s0 + $0x128] sm:$0x7]  ;;  %v65_v52 = vld [vmem:[%s6239_s0 + $0x138] sm:$0x7]  ;;  %vm700_vm10 = vcmask 867328  }
   0xd   :  { %v2883_v53 = vpack.c.bf16 %v56_v47, %v52_v46  ;;  %v2863_v54 = vpack.c.bf16 %v63_v49, %v59_v48  ;;  %vm4068_vm2 = vmpackc.low %vm94_vm0, %vm3896_vm1  ;;  %v58_v56 = vld [vmem:[%s6239_s0 + $0x100] sm:$0xff]  ;;  %v2885_v58 = vpack.c.bf16 %v65_v52, %v61_v50  ;;  %v60_v59 = vld [vmem:[%s6239_s0 + $0x110] sm:$0xff]  ;;  %vm752_vm11 = vcmask 859136  }
   0xe   :  { %2858 = vmatpush1.bf16.msra.mxu0 %v2857_v36  ;;  %v62_v57 = vld [vmem:[%s6239_s0 + $0x120] sm:$0x7]  ;;  %v64_v60 = vld [vmem:[%s6239_s0 + $0x130] sm:$0x7]  ;;  %v67_v0 = vld [vmem:[%s6240_s2 + $0x8] sm:$0xff]  ;;  %s3917_s0 = smov 84  }
   0xf   :  { %2880 = vmatpush1.bf16.msra.mxu1 %v2879_v40  ;;  %2860 = vmatprep.subr.bf16.mxu0 %v2859_v41  ;;  %v66_v61 = vld [vmem:[%s6240_s2] sm:$0xff]  ;;  %v68_v62 = vld [vmem:[%s6240_s2 + $0x10] sm:$0xff]  ;;  %v2866_v63 = vpack.c.bf16 %v62_v57, %v58_v56  ;;  %v2888_v1 = vpack.c.bf16 %v64_v60, %v60_v59  ;;  %v24_v4 = vld [vmem:[%s6241_s1 + $0x8] sm:$0xff]  ;;  %s3919_s2 = smov 48   ;;  %vm1480_vm12 = vcmask 375808   ;;  %vm804_vm13 = vcmask 850944  }
  0x10   :  { %2882 = vmatprep.subr.bf16.mxu1 %v2881_v45  ;;  %71 = vperm.xlu0 %3189, %v66_v61   ;;  %v23_v2 = vld [vmem:[%s6241_s1] sm:$0xff]  ;;  %v25_v5 = vld [vmem:[%s6241_s1 + $0x10] sm:$0xff]  ;;  %s3897_s1 = smov 127   ;;  %vm1532_vm14 = vcmask 367616   ;;  %vm1428_vm15 = vcmask 384000   ;;  %vm1116_vm0 = vcmask 556032  }
  0x11   :  { %81 = vperm.xlu1 %3190, %v68_v62   ;;  %v309_v11 = vld [vmem:[%s6242_s3] sm:$0xf]  ;;  %s3898_s3 = smov 126   ;;  %vm1584_vm1 = vcmask 359424  }
  0x12   :  { %2862 = vmatpush1.bf16.msra.mxu0 %v2861_v51  ;;  %v4118_v22 = vrot.slane %v309_v11, %v313_v9  ;;  %v4120_v25 = vrot.slane %v309_v11, %v321_v12  ;;  %v4122_v28 = vrot.slane %v309_v11, %v317_v13  ;;  %v4124_v32 = vrot.slane %v309_v11, %v325_v17 }
  0x13   :  { %2884 = vmatpush1.bf16.msra.mxu1 %v2883_v53  ;;  %2865 = vmatprep.subr.msk.bf16.mxu0 %vm4068_vm2, %v2863_v54 }
  0x14   :  { %2887 = vmatprep.subr.msk.bf16.mxu1 %vm4068_vm2, %v2885_v58  ;;  %76 = vperm.xlu0 %3189, %v67_v0  }
  0x16   :  { %2868 = vmatpush1.bf16.msk.msra.mxu0 %vm4068_vm2, %v2866_v63 }
  0x17   :  { %2890 = vmatpush1.bf16.msk.msra.mxu1 %vm4068_vm2, %v2888_v1  ;;  %vm908_vm2 = vcmask 711680  }
  0x19   :  { %2625 = vmatmul.mubr.msk.f32.vlgmr.msra.gmra.mrb[0].mxu0 %vm84_vm3, %v23_v2 }
  0x1a   :  { %2630 = vmatmul.mubr.msk.f32.vlgmr.msra.gmra.mrb[0].mxu1 %vm84_vm3, %v23_v2  ;;  %177 = vmatprep.mubr.f32.mxu0 %v6246_v3 }
  0x1b   :  { %260 = vmatprep.mubr.f32.mxu1 %v6246_v3 }
  0x1d   :  { %2626 = vmatmul.mubr.msk.f32.gmra.mrb[2].mxu0 %vm84_vm3, %v24_v4 }
  0x1e   :  { %2631 = vmatmul.mubr.msk.f32.gmra.mrb[2].mxu1 %vm84_vm3, %v24_v4  ;;  %183 = vmatprep.mubr.f32.mxu0 %v6246_v3 }
  0x1f   :  { %266 = vmatprep.mubr.f32.mxu1 %v6246_v3 }
  0x21   :  { %2627 = vmatmul.mubr.msk.f32.gmra.mrb[4].mxu0 %vm84_vm3, %v25_v5 }
  0x22   :  { %2632 = vmatmul.mubr.msk.f32.gmra.mrb[4].mxu1 %vm84_vm3, %v25_v5  ;;  %vm1012_vm3 = vcmask 695296  }
  0x23   :  { %2213 = vmatprep.mubr.f32.mxu1 %v6246_v3 }
  0x8f   :  { %v72_v8 = vpop.permute.xlu0 %71 }
  0x90   :  { %v82_v49 = vpop.permute.xlu1 %81 }
  0x93   :  { %v77_v26 = vpop.permute.xlu0 %76 }
  0xec   :  { %v173_v10 = vpop.f32.mrb[0].mxu0 }
  0xed   :  { %v174_v14 = vadd.f32 %v173_v10, %v72_v8  ;;  %v256_v15 = vpop.f32.mrb[0].mxu1  ;;  %v175_v16 = vpop.f32.mrb[1].mxu0 }
  0xee   :  { %v257_v18 = vadd.f32 %v256_v15, %v72_v8  ;;  %v176_v19 = vadd.f32 %v175_v16, %v72_v8  ;;  %v258_v20 = vpop.f32.mrb[1].mxu1 }
  0xef   :  { %v2633_v21 = vadd.f32 -10.0, %v174_v14  ;;  %v259_v23 = vadd.f32 %v258_v20, %v72_v8 }
  0xf0   :  { %v2635_v24 = vadd.f32 -10.0, %v257_v18  ;;  %v2634_v27 = vadd.f32 -10.0, %v176_v19  ;;  %v179_v29 = vpop.f32.mrb[2].mxu0 }
  0xf1   :  { %v285_v30 = vmax.f32 %v2633_v21, 0.0  ;;  %v2636_v31 = vadd.f32 -10.0, %v259_v23  ;;  %v180_v33 = vadd.f32 %v179_v29, %v77_v26  ;;  %v262_v34 = vpop.f32.mrb[2].mxu1  ;;  %v181_v35 = vpop.f32.mrb[3].mxu0 }
  0xf2   :  { %v287_v36 = vmax.f32 %v2635_v24, 0.0  ;;  %v286_v37 = vmax.f32 %v2634_v27, 0.0  ;;  %v263_v38 = vadd.f32 %v262_v34, %v77_v26  ;;  %v182_v39 = vadd.f32 %v181_v35, %v77_v26  ;;  %v264_v40 = vpop.f32.mrb[3].mxu1 }
  0xf3   :  { %v297_v41 = vadd.f32 1.0, %v285_v30  ;;  %v288_v42 = vmax.f32 %v2636_v31, 0.0  ;;  %v2637_v43 = vadd.f32 -10.0, %v180_v33  ;;  %v265_v44 = vadd.f32 %v264_v40, %v77_v26 }
  0xf4   :  { %v299_v45 = vadd.f32 1.0, %v287_v36  ;;  %v298_v46 = vadd.f32 1.0, %v286_v37  ;;  %v2639_v47 = vadd.f32 -10.0, %v263_v38  ;;  %v2638_v48 = vadd.f32 -10.0, %v182_v39  ;;  %v185_v50 = vpop.f32.mrb[4].mxu0 }
  0xf5   :  { %v4127_v51 = vmul.f32 %v4118_v22, %v297_v41  ;;  %v300_v52 = vadd.f32 1.0, %v288_v42  ;;  %v289_v53 = vmax.f32 %v2637_v43, 0.0  ;;  %v2640_v54 = vadd.f32 -10.0, %v265_v44  ;;  %v268_v55 = vpop.f32.mrb[4].mxu1  ;;  %v187_v56 = vpop.f32.mrb[5].mxu0 }
  0xf6   :  { %v4130_v57 = vmul.f32 %v4120_v25, %v299_v45  ;;  %v4133_v58 = vmul.f32 %v4122_v28, %v298_v46  ;;  %v291_v59 = vmax.f32 %v2639_v47, 0.0  ;;  %v290_v60 = vmax.f32 %v2638_v48, 0.0  ;;  %v270_v61 = vpop.f32.mrb[5].mxu1 }
  0xf7   :  { %v4136_v62 = vmul.f32 %v4124_v32, %v300_v52  ;;  %v301_v63 = vadd.f32 1.0, %v289_v53  ;;  %v292_v0 = vmax.f32 %v2640_v54, 0.0  ;;  %v186_v1 = vadd.f32 %v185_v50, %v82_v49 }
  0xf8   :  { %6372 = vst [vmem:[#allocation3_spill] sm:$0xff] %v4130_v57  ;;  %v303_v2 = vadd.f32 1.0, %v291_v59  ;;  %v302_v4 = vadd.f32 1.0, %v290_v60  ;;  %v269_v5 = vadd.f32 %v268_v55, %v82_v49  ;;  %v188_v6 = vadd.f32 %v187_v56, %v82_v49 }
  0xf9   :  { %v4139_v7 = vmul.f32 %v4118_v22, %v301_v63  ;;  %v304_v8 = vadd.f32 1.0, %v292_v0  ;;  %v2641_v9 = vadd.f32 -10.0, %v186_v1  ;;  %v271_v10 = vadd.f32 %v270_v61, %v82_v49 }
  0xfa   :  { %v4142_v11 = vmul.f32 %v4120_v25, %v303_v2  ;;  %v4145_v12 = vmul.f32 %v4122_v28, %v302_v4  ;;  %v2643_v13 = vadd.f32 -10.0, %v269_v5  ;;  %v2642_v14 = vadd.f32 -10.0, %v188_v6 }
  0xfb   :  { %v4148_v15 = vmul.f32 %v4124_v32, %v304_v8  ;;  %v293_v16 = vmax.f32 %v2641_v9, 0.0  ;;  %v2644_v17 = vadd.f32 -10.0, %v271_v10  ;;  %v4152_v18 = vpack.i.bf16 %v4136_v62, %v4130_v57 }
  0xfc   :  { %6373 = vst [vmem:[#allocation4_spill] sm:$0xff] %v4142_v11  ;;  %v295_v19 = vmax.f32 %v2643_v13, 0.0  ;;  %v294_v20 = vmax.f32 %v2642_v14, 0.0  ;;  %v3191_v21 = vpack.i.bf16 %v4133_v58, %v4127_v51  ;;  %v2891_v26 = vpack.c.bf16 %v4145_v12, %v4133_v58 }
  0xfd   :  { %v305_v23 = vadd.f32 1.0, %v293_v16  ;;  %v296_v24 = vmax.f32 %v2644_v17, 0.0  ;;  %3197 = vrot.lane.b32.xlu0 %v4152_v18, %s3897_s1  ;;  %v2893_v30 = vpack.c.bf16 %v4139_v7, %v4127_v51  ;;  %v4199_v37 = vpack.i.bf16 %v4145_v12, %v4139_v7 }
  0xfe   :  { %v307_v27 = vadd.f32 1.0, %v295_v19  ;;  %v306_v29 = vadd.f32 1.0, %v294_v20  ;;  %3192 = vrot.lane.b32.xlu1 %v3191_v21, %s3897_s1  ;;  %2892 = vmatprep.subr.bf16.mxu0 %v2891_v26  ;;  %v4206_v38 = vpack.i.bf16 %v4145_v12, %v4127_v51  ;;  %v4222_v39 = vpack.i.bf16 %v4145_v12, %v4133_v58 }
  0xff   :  { %v4164_v31 = vmul.f32 %v4118_v22, %v305_v23  ;;  %v308_v33 = vadd.f32 1.0, %v296_v24  ;;  %2894 = vmatpush1.bf16.msra.mxu0 %v2893_v30  ;;  %v4180_v22 = vpack.i.bf16 %v4130_v57, %v4133_v58  ;;  %v4230_v40 = vpack.i.bf16 %v4127_v51, %v4133_v58 }
 0x100   :  { %v4167_v34 = vmul.f32 %v4120_v25, %v307_v27  ;;  %v4170_v35 = vmul.f32 %v4122_v28, %v306_v29  ;;  %v4184_v25 = vpack.i.bf16 %v4148_v15, %v4142_v11  ;;  %v4191_v28 = vpack.i.bf16 %v4139_v7, %v4127_v51 }
 0x101   :  { %v4173_v36 = vmul.f32 %v4124_v32, %v308_v33  ;;  %3207 = vrot.lane.b32.xlu0 %v4152_v18, %s3898_s3  ;;  %v4195_v32 = vpack.i.bf16 %v4142_v11, %v4145_v12  ;;  %v4236_v41 = vpack.i.bf16 %v4148_v15, %v4136_v62  ;;  %v4312_v43 = vpack.i.bf16 %v4164_v31, %v4139_v7 }
 0x102   :  { %6374 = vst [vmem:[#allocation5_spill] sm:$0xff] %v4167_v34  ;;  %3202 = vrot.lane.b32.xlu1 %v3191_v21, %s3898_s3  ;;  %v4339_v53 = vpack.i.bf16 %v4139_v7, %v4167_v34  ;;  %v4351_v58 = vpack.i.bf16 %v4136_v62, %v4164_v31  ;;  %v3526_v10 = vpack.i.bf16 %v4170_v35, %v4164_v31 }
 0x103   :  { %v4379_v1 = vpack.i.bf16 %v4173_v36, %v4167_v34 }
 0x105   :  { %3217 = vrot.lane.b32.xlu0 %v4152_v18, %s3899_s17 }
 0x106   :  { %3212 = vrot.lane.b32.xlu1 %v3191_v21, %s3899_s17 }
 0x109   :  { %3227 = vrot.lane.b32.xlu0 %v4152_v18, %s3900_s18 }
 0x10a   :  { %3222 = vrot.lane.b32.xlu1 %v3191_v21, %s3900_s18 }
 0x10d   :  { %3237 = vrot.lane.b32.xlu0 %v4152_v18, %s3901_s19 }
 0x10e   :  { %3232 = vrot.lane.b32.xlu1 %v3191_v21, %s3901_s19 }
 0x111   :  { %3247 = vrot.lane.b32.xlu0 %v4152_v18, %s3902_s20 }
 0x112   :  { %3242 = vrot.lane.b32.xlu1 %v3191_v21, %s3902_s20 }
 0x115   :  { %3257 = vrot.lane.b32.xlu0 %v4152_v18, %s3903_s21 }
 0x116   :  { %3252 = vrot.lane.b32.xlu1 %v3191_v21, %s3903_s21 }
 0x119   :  { %3267 = vrot.lane.b32.xlu0 %v4152_v18, %s3904_s22 }
 0x11a   :  { %3262 = vrot.lane.b32.xlu1 %v3191_v21, %s3904_s22 }
 0x11d   :  { %3287 = vrot.lane.b32.xlu0 %v4180_v22, %s3905_s23 }
 0x11e   :  { %3272 = vrot.lane.b32.xlu1 %v4180_v22, %s3906_s24 }
 0x121   :  { %3297 = vrot.lane.b32.xlu0 %v4180_v22, %s3907_s25 }
 0x122   :  { %3277 = vrot.lane.b32.xlu1 %v4180_v22, %s3908_s26 }
 0x125   :  { %3317 = vrot.lane.b32.xlu0 %v4180_v22, %s3909_s27 }
 0x126   :  { %3282 = vrot.lane.b32.xlu1 %v4180_v22, %s3910_s28 }
 0x129   :  { %3347 = vrot.lane.b32.xlu0 %v4184_v25, %s3897_s1 }
 0x12a   :  { %3292 = vrot.lane.b32.xlu1 %v4180_v22, %s3911_s29 }
 0x12d   :  { %3357 = vrot.lane.b32.xlu0 %v4184_v25, %s3898_s3 }
 0x12e   :  { %3302 = vrot.lane.b32.xlu1 %v4152_v18, %s3912_s30 }
 0x131   :  { %3367 = vrot.lane.b32.xlu0 %v4184_v25, %s3899_s17 }
 0x132   :  { %3307 = vrot.lane.b32.xlu1 %v4180_v22, %s3913_s7 }
 0x135   :  { %3377 = vrot.lane.b32.xlu0 %v4184_v25, %s3900_s18 }
 0x136   :  { %3312 = vrot.lane.b32.xlu1 %v4152_v18, %s3914_s8 }
 0x139   :  { %3387 = vrot.lane.b32.xlu0 %v4184_v25, %s3901_s19 }
 0x13a   :  { %3322 = vrot.lane.b32.xlu1 %v4191_v28, %s3906_s24 }
 0x13d   :  { %3397 = vrot.lane.b32.xlu0 %v4184_v25, %s3902_s20 }
 0x13e   :  { %3327 = vrot.lane.b32.xlu1 %v4191_v28, %s3910_s28 }
 0x141   :  { %3407 = vrot.lane.b32.xlu0 %v4184_v25, %s3903_s21 }
 0x142   :  { %3332 = vrot.lane.b32.xlu1 %v4191_v28, %s3911_s29 }
 0x145   :  { %3417 = vrot.lane.b32.xlu0 %v4184_v25, %s3904_s22 }
 0x146   :  { %3337 = vrot.lane.b32.xlu1 %v4191_v28, %s3913_s7 }
 0x149   :  { %3422 = vrot.lane.b32.xlu0 %v4195_v32, %s3915_s9 }
 0x14a   :  { %3342 = vrot.lane.b32.xlu1 %v4199_v37, %s3897_s1 }
 0x14d   :  { %3427 = vrot.lane.b32.xlu0 %v4195_v32, %s3906_s24 }
 0x14e   :  { %3352 = vrot.lane.b32.xlu1 %v4199_v37, %s3898_s3 }
 0x151   :  { %3437 = vrot.lane.b32.xlu0 %v4195_v32, %s3910_s28 }
 0x152   :  { %3362 = vrot.lane.b32.xlu1 %v4199_v37, %s3899_s17 }
 0x155   :  { %3447 = vrot.lane.b32.xlu0 %v4195_v32, %s3911_s29 }
 0x156   :  { %3372 = vrot.lane.b32.xlu1 %v4199_v37, %s3900_s18 }
 0x159   :  { %3452 = vrot.lane.b32.xlu0 %v4206_v38, %s3907_s25 }
 0x15a   :  { %3382 = vrot.lane.b32.xlu1 %v4199_v37, %s3901_s19 }
 0x15d   :  { %3457 = vrot.lane.b32.xlu0 %v4184_v25, %s3912_s30 }
 0x15e   :  { %3392 = vrot.lane.b32.xlu1 %v4199_v37, %s3902_s20 }
 0x161   :  { %3462 = vrot.lane.b32.xlu0 %v4195_v32, %s3913_s7 }
 0x162   :  { %3402 = vrot.lane.b32.xlu1 %v4199_v37, %s3903_s21 }
 0x165   :  { %3467 = vrot.lane.b32.xlu0 %v4206_v38, %s3909_s27 }
 0x166   :  { %3412 = vrot.lane.b32.xlu1 %v4199_v37, %s3904_s22 }
 0x169   :  { %3477 = vrot.lane.b32.xlu0 %v4312_v43, %s3915_s9 }
 0x16a   :  { %3432 = vrot.lane.b32.xlu1 %v4206_v38, %s3908_s26 }
 0x16d   :  { %1472 = vrot.lane.b32.xlu0 %v4164_v31, %s3906_s24 }
 0x16e   :  { %3442 = vrot.lane.b32.xlu1 %v4206_v38, %s3905_s23 }
 0x16f   :  { %v4322_v44 = vpop.permute.xlu0 %3197 }
 0x170   :  { %v6252_v45 = vunpack.i.l.bf16 %v4322_v44  ;;  %v3193_v46 = vpop.permute.xlu1 %3192 }
 0x171   :  { %v3195_v47 = vunpack.i.h.bf16 %v3193_v46  ;;  %v3194_v48 = vunpack.i.l.bf16 %v3193_v46  ;;  %1524 = vrot.lane.b32.xlu0 %v4164_v31, %s3908_s26 }
 0x172   :  { %3472 = vrot.lane.b32.xlu1 %v4184_v25, %s3914_s8 }
 0x173   :  { %v389_v49 = vsel %vm388_vm4, %v3194_v48, %v3195_v47  ;;  %v4330_v50 = vpop.permute.xlu0 %3207  ;;  %v390_v51 = vsel %vm388_vm4, %v3195_v47, %v6252_v45 }
 0x174   :  { %v4335_v52 = vpop.permute.xlu1 %3202  ;;  %v2895_v54 = vpack.c.bf16 %v390_v51, %v4170_v35  ;;  %v2897_v55 = vpack.c.bf16 %v389_v49, %v4164_v31  ;;  %v3210_v21 = vunpack.i.h.bf16 %v4330_v50  ;;  %v6250_v23 = vunpack.i.l.bf16 %v4330_v50 }
 0x175   :  { %1576 = vrot.lane.b32.xlu0 %v4164_v31, %s3910_s28 }
 0x176   :  { %3482 = vrot.lane.b32.xlu1 %v4339_v53, %s3908_s26  ;;  %2896 = vmatprep.subr.bf16.mxu0 %v2895_v54  ;;  %v4446_v30 = vsel %vm440_vm5, %v6250_v23, %v3210_v21 }
 0x177   :  { %2898 = vmatpush1.bf16.msra.mxu0 %v2897_v55  ;;  %v4347_v56 = vpop.permute.xlu0 %3217  ;;  %6380 = vst [vmem:[#allocation11_spill] sm:$0xff] %v4446_v30 }
 0x178   :  { %v4353_v59 = vpop.permute.xlu1 %3212 }
 0x179   :  { %3492 = vrot.lane.b32.xlu0 %v4351_v58, %s3905_s23 }
 0x17a   :  { %1580 = vrot.lane.b32.xlu1 %v4167_v34, %s3910_s28 }
 0x17b   :  { %v4359_v60 = vpop.permute.xlu0 %3227 }
 0x17c   :  { %v4361_v61 = vpop.permute.xlu1 %3222  ;;  %v3230_v48 = vunpack.i.h.bf16 %v4359_v60  ;;  %v6248_v49 = vunpack.i.l.bf16 %v4359_v60 }
 0x17d   :  { %3507 = vrot.lane.b32.xlu0 %v4351_v58, %s3907_s25 }
 0x17e   :  { %3487 = vrot.lane.b32.xlu1 %v4339_v53, %s3905_s23 }
 0x17f   :  { %v4367_v62 = vpop.permute.xlu0 %3237 }
 0x180   :  { %v4369_v63 = vpop.permute.xlu1 %3232 }
 0x181   :  { %3522 = vrot.lane.b32.xlu0 %v4351_v58, %s3909_s27 }
 0x182   :  { %3497 = vrot.lane.b32.xlu1 %v4351_v58, %s3911_s29 }
 0x183   :  { %v4375_v0 = vpop.permute.xlu0 %3247 }
 0x184   :  { %v4381_v2 = vpop.permute.xlu1 %3242 }
 0x185   :  { %3532 = vrot.lane.b32.xlu0 %v4379_v1, %s3897_s1 }
 0x186   :  { %3502 = vrot.lane.b32.xlu1 %v4339_v53, %s3907_s25 }
 0x187   :  { %v4387_v4 = vpop.permute.xlu0 %3257 }
 0x188   :  { %v4389_v5 = vpop.permute.xlu1 %3252 }
 0x189   :  { %3542 = vrot.lane.b32.xlu0 %v4379_v1, %s3898_s3 }
 0x18a   :  { %3512 = vrot.lane.b32.xlu1 %v4351_v58, %s3913_s7 }
 0x18b   :  { %v4395_v6 = vpop.permute.xlu0 %3267 }
 0x18c   :  { %v4397_v7 = vpop.permute.xlu1 %3262 }
 0x18d   :  { %3552 = vrot.lane.b32.xlu0 %v4379_v1, %s3899_s17 }
 0x18e   :  { %3517 = vrot.lane.b32.xlu1 %v4339_v53, %s3909_s27 }
 0x18f   :  { %v4403_v8 = vpop.permute.xlu0 %3287 }
 0x190   :  { %v4405_v9 = vpop.permute.xlu1 %3272 }
 0x191   :  { %6375 = vst [vmem:[#allocation6_spill] sm:$0xff] %v4405_v9  ;;  %3562 = vrot.lane.b32.xlu0 %v4379_v1, %s3900_s18 }
 0x192   :  { %3527 = vrot.lane.b32.xlu1 %v3526_v10, %s3897_s1 }
 0x193   :  { %v4412_v13 = vpop.permute.xlu0 %3297 }
 0x194   :  { %v4414_v14 = vpop.permute.xlu1 %3277 }
 0x195   :  { %6376 = vst [vmem:[#allocation7_spill] sm:$0xff] %v4414_v14  ;;  %3572 = vrot.lane.b32.xlu0 %v4379_v1, %s3901_s19 }
 0x196   :  { %3537 = vrot.lane.b32.xlu1 %v3526_v10, %s3898_s3 }
 0x197   :  { %v4419_v16 = vpop.permute.xlu0 %3317 }
 0x198   :  { %v4421_v17 = vpop.permute.xlu1 %3282 }
 0x199   :  { %6377 = vst [vmem:[#allocation8_spill] sm:$0xff] %v4421_v17  ;;  %3582 = vrot.lane.b32.xlu0 %v4379_v1, %s3902_s20 }
 0x19a   :  { %3547 = vrot.lane.b32.xlu1 %v3526_v10, %s3899_s17 }
 0x19b   :  { %v4426_v19 = vpop.permute.xlu0 %3347 }
 0x19c   :  { %v4428_v20 = vpop.permute.xlu1 %3292 }
 0x19d   :  { %6378 = vst [vmem:[#allocation9_spill] sm:$0xff] %v4428_v20  ;;  %3592 = vrot.lane.b32.xlu0 %v4379_v1, %s3903_s21 }
 0x19e   :  { %3557 = vrot.lane.b32.xlu1 %v3526_v10, %s3900_s18 }
 0x19f   :  { %v4435_v24 = vpop.permute.xlu0 %3357 }
 0x1a0   :  { %v3360_v26 = vunpack.i.h.bf16 %v4435_v24  ;;  %v6251_v27 = vunpack.i.l.bf16 %v4435_v24  ;;  %v4439_v29 = vpop.permute.xlu1 %3302 }
 0x1a1   :  { %6379 = vst [vmem:[#allocation10_spill] sm:$0xff] %v4439_v29  ;;  %3612 = vrot.lane.b32.xlu0 %v4184_v25, %s3916_s10  ;;  %v6419_v29 = vunpack.i.l.bf16 %v4426_v19 }
 0x1a2   :  { %v4451_v33 = vsel %vm440_vm5, %v6251_v27, %v3360_v26  ;;  %3567 = vrot.lane.b32.xlu1 %v3526_v10, %s3901_s19  ;;  %v3681_v27 = vpack.i.bf16 %v4170_v35, %v4142_v11 }
 0x1a3   :  { %6381 = vst [vmem:[#allocation12_spill] sm:$0xff] %v4451_v33  ;;  %v4454_v37 = vpop.permute.xlu0 %3367 }
 0x1a4   :  { %v4458_v47 = vpop.permute.xlu1 %3307 }
 0x1a5   :  { %6382 = vst [vmem:[#allocation13_spill] sm:$0xff] %v4458_v47  ;;  %3622 = vrot.lane.b32.xlu0 %v4195_v32, %s3917_s0  ;;  %v4476_v32 = vsel %vm544_vm6, %v6248_v49, %v3230_v48 }
 0x1a6   :  { %3577 = vrot.lane.b32.xlu1 %v3526_v10, %s3902_s20  ;;  %6384 = vst [vmem:[#allocation15_spill] sm:$0xff] %v4476_v32 }
 0x1a7   :  { %v4465_v51 = vpop.permute.xlu0 %3377 }
 0x1a8   :  { %v3380_v54 = vunpack.i.h.bf16 %v4465_v51  ;;  %v6249_v55 = vunpack.i.l.bf16 %v4465_v51  ;;  %v4469_v21 = vpop.permute.xlu1 %3312 }
 0x1a9   :  { %6383 = vst [vmem:[#allocation14_spill] sm:$0xff] %v4469_v21  ;;  %3637 = vrot.lane.b32.xlu0 %v4180_v22, %s3918_s11 }
 0x1aa   :  { %v4481_v26 = vsel %vm544_vm6, %v6249_v55, %v3380_v54  ;;  %3587 = vrot.lane.b32.xlu1 %v3526_v10, %s3903_s21  ;;  %v4499_v54 = vpack.i.bf16 %v4167_v34, %v4170_v35 }
 0x1ab   :  { %6385 = vst [vmem:[#allocation16_spill] sm:$0xff] %v4481_v26  ;;  %v4484_v46 = vpop.permute.xlu0 %3387 }
 0x1ac   :  { %v4488_v42 = vpop.permute.xlu1 %3322 }
 0x1ad   :  { %6386 = vst [vmem:[#allocation17_spill] sm:$0xff] %v4488_v42  ;;  %3647 = vrot.lane.b32.xlu0 %v4206_v38, %s3918_s11  ;;  %v3245_v42 = vunpack.i.h.bf16 %v4381_v2 }
 0x1ae   :  { %3597 = vrot.lane.b32.xlu1 %v3526_v10, %s3904_s22 }
 0x1af   :  { %v4493_v48 = vpop.permute.xlu0 %3397 }
 0x1b0   :  { %6387 = vst [vmem:[#allocation18_spill] sm:$0xff] %v4493_v48  ;;  %v4495_v49 = vpop.permute.xlu1 %3327 }
 0x1b1   :  { %6388 = vst [vmem:[#allocation19_spill] sm:$0xff] %v4495_v49  ;;  %3662 = vrot.lane.b32.xlu0 %v4351_v58, %s3918_s11  ;;  %v1613_v49 = vld [vmem:[%s6243_s4 + $0x8] sm:$0xff] }
 0x1b2   :  { %3602 = vrot.lane.b32.xlu1 %v4499_v54, %s3915_s9  ;;  %1999 = vmatprep.mubr.f32.mxu0 %v1613_v49 }
 0x1b3   :  { %v4505_v3 = vpop.permute.xlu0 %3407 }
 0x1b4   :  { %6389 = vst [vmem:[#allocation20_spill] sm:$0xff] %v4505_v3  ;;  %v4507_v55 = vpop.permute.xlu1 %3332 }
 0x1b5   :  { %6390 = vst [vmem:[#allocation21_spill] sm:$0xff] %v4507_v55  ;;  %3672 = vrot.lane.b32.xlu0 %v4184_v25, %s3919_s2 }
 0x1b6   :  { %3607 = vrot.lane.b32.xlu1 %v4152_v18, %s3916_s10 }
 0x1b7   :  { %v4513_v38 = vpop.permute.xlu0 %3417 }
 0x1b8   :  { %6391 = vst [vmem:[#allocation22_spill] sm:$0xff] %v4513_v38  ;;  %v4515_v10 = vpop.permute.xlu1 %3337 }
 0x1b9   :  { %6392 = vst [vmem:[#allocation23_spill] sm:$0xff] %v4515_v10  ;;  %3677 = vrot.lane.b32.xlu0 %v4499_v54, %s3906_s24  ;;  %v4557_v10 = vpack.i.bf16 %v4173_v36, %v4148_v15 }
 0x1ba   :  { %3617 = vrot.lane.b32.xlu1 %v4180_v22, %s3917_s0 }
 0x1bb   :  { %v4521_v23 = vpop.permute.xlu0 %3422 }
 0x1bc   :  { %6393 = vst [vmem:[#allocation24_spill] sm:$0xff] %v4521_v23  ;;  %v4525_v45 = vpop.permute.xlu1 %3342  ;;  %v3249_v23 = vunpack.i.l.bf16 %v4375_v0 }
 0x1bd   :  { %3682 = vrot.lane.b32.xlu0 %v3681_v27, %s3908_s26 }
 0x1be   :  { %3627 = vrot.lane.b32.xlu1 %v4191_v28, %s3917_s0 }
 0x1bf   :  { %v4530_v32 = vpop.permute.xlu0 %3427 }
 0x1c0   :  { %6394 = vst [vmem:[#allocation25_spill] sm:$0xff] %v4530_v32  ;;  %v4532_v26 = vpop.permute.xlu1 %3352  ;;  %v3250_v32 = vunpack.i.h.bf16 %v4375_v0 }
 0x1c1   :  { %1578 = vrot.lane.b32.xlu0 %v4170_v35, %s3910_s28 }
 0x1c2   :  { %3632 = vrot.lane.b32.xlu1 %v4152_v18, %s3920_s12 }
 0x1c3   :  { %v4538_v22 = vpop.permute.xlu0 %3437 }
 0x1c4   :  { %6395 = vst [vmem:[#allocation26_spill] sm:$0xff] %v4538_v22  ;;  %v4540_v30 = vpop.permute.xlu1 %3362 }
 0x1c5   :  { %3697 = vrot.lane.b32.xlu0 %v4191_v28, %s3912_s30 }
 0x1c6   :  { %3642 = vrot.lane.b32.xlu1 %v4351_v58, %s3917_s0 }
 0x1c7   :  { %v4546_v33 = vpop.permute.xlu0 %3447 }
 0x1c8   :  { %6396 = vst [vmem:[#allocation27_spill] sm:$0xff] %v4546_v33  ;;  %v4548_v57 = vpop.permute.xlu1 %3372 }
 0x1c9   :  { %3702 = vrot.lane.b32.xlu0 %v3681_v27, %s3905_s23 }
 0x1ca   :  { %3652 = vrot.lane.b32.xlu1 %v4184_v25, %s3920_s12 }
 0x1cb   :  { %v4553_v11 = vpop.permute.xlu0 %3452 }
 0x1cc   :  { %6397 = vst [vmem:[#allocation28_spill] sm:$0xff] %v4553_v11  ;;  %v4559_v55 = vpop.permute.xlu1 %3382 }
 0x1cd   :  { %3707 = vrot.lane.b32.xlu0 %v4557_v10, %s3905_s23 }
 0x1ce   :  { %3657 = vrot.lane.b32.xlu1 %v4339_v53, %s3918_s11 }
 0x1cf   :  { %v4565_v58 = vpop.permute.xlu0 %3457 }
 0x1d0   :  { %6398 = vst [vmem:[#allocation29_spill] sm:$0xff] %v4565_v58  ;;  %v4567_v33 = vpop.permute.xlu1 %3392 }
 0x1d1   :  { %6399 = vst [vmem:[#allocation30_spill] sm:$0xff] %v4567_v33  ;;  %3722 = vrot.lane.b32.xlu0 %v3681_v27, %s3907_s25 }
 0x1d2   :  { %3667 = vrot.lane.b32.xlu1 %v4152_v18, %s3919_s2 }
 0x1d3   :  { %v4572_v25 = vpop.permute.xlu0 %3462 }
 0x1d4   :  { %6400 = vst [vmem:[#allocation31_spill] sm:$0xff] %v4572_v25  ;;  %v4574_v15 = vpop.permute.xlu1 %3402 }
 0x1d5   :  { %6401 = vst [vmem:[#allocation32_spill] sm:$0xff] %v4574_v15  ;;  %3727 = vrot.lane.b32.xlu0 %v4379_v1, %s3912_s30  ;;  %v3205_v15 = vunpack.i.h.bf16 %v4335_v52 }
 0x1d6   :  { %3687 = vrot.lane.b32.xlu1 %v4379_v1, %s3904_s22 }
 0x1d7   :  { %v4580_v53 = vpop.permute.xlu0 %3467 }
 0x1d8   :  { %6402 = vst [vmem:[#allocation33_spill] sm:$0xff] %v4580_v53  ;;  %v4582_v58 = vpop.permute.xlu1 %3412 }
 0x1d9   :  { %6403 = vst [vmem:[#allocation34_spill] sm:$0xff] %v4582_v58  ;;  %3732 = vrot.lane.b32.xlu0 %v4557_v10, %s3907_s25 }
 0x1da   :  { %3692 = vrot.lane.b32.xlu1 %v4222_v39, %s3912_s30 }
 0x1db   :  { %v4588_v11 = vpop.permute.xlu0 %3477 }
 0x1dc   :  { %6404 = vst [vmem:[#allocation35_spill] sm:$0xff] %v4588_v11  ;;  %v4590_v25 = vpop.permute.xlu1 %3432  ;;  %v3355_v11 = vunpack.i.h.bf16 %v4532_v26 }
 0x1dd   :  { %6405 = vst [vmem:[#allocation36_spill] sm:$0xff] %v4590_v25  ;;  %3742 = vrot.lane.b32.xlu0 %v4379_v1, %s3914_s8 }
 0x1de   :  { %3712 = vrot.lane.b32.xlu1 %v4499_v54, %s3911_s29 }
 0x1df   :  { %v4599_v53 = vpop.permute.xlu0 %1472 }
 0x1e0   :  { %6406 = vst [vmem:[#allocation37_spill] sm:$0xff] %v4599_v53  ;;  %v4601_v21 = vpop.permute.xlu1 %3442 }
 0x1e1   :  { %6407 = vst [vmem:[#allocation38_spill] sm:$0xff] %v4601_v21  ;;  %3752 = vrot.lane.b32.xlu0 %v3681_v27, %s3909_s27 }
 0x1e2   :  { %3717 = vrot.lane.b32.xlu1 %v4557_v10, %s3911_s29 }
 0x1e3   :  { %v4606_v47 = vpop.permute.xlu0 %1524 }
 0x1e4   :  { %6408 = vst [vmem:[#allocation39_spill] sm:$0xff] %v4606_v47  ;;  %v4608_v22 = vpop.permute.xlu1 %3472 }
 0x1e5   :  { %6409 = vst [vmem:[#allocation40_spill] sm:$0xff] %v4608_v22  ;;  %3757 = vrot.lane.b32.xlu0 %v4379_v1, %s3916_s10 }
 0x1e6   :  { %3737 = vrot.lane.b32.xlu1 %v4499_v54, %s3913_s7 }
 0x1e7   :  { %v4614_v49 = vpop.permute.xlu0 %1576 }
 0x1e8   :  { %6410 = vst [vmem:[#allocation41_spill] sm:$0xff] %v4614_v49  ;;  %v4616_v53 = vpop.permute.xlu1 %3482 }
 0x1e9   :  { %6411 = vst [vmem:[#allocation42_spill] sm:$0xff] %v4616_v53  ;;  %3762 = vrot.lane.b32.xlu0 %v4557_v10, %s3909_s27 }
 0x1ea   :  { %3747 = vrot.lane.b32.xlu1 %v4557_v10, %s3913_s7 }
 0x1eb   :  { %v4622_v21 = vpop.permute.xlu0 %3492 }
 0x1ec   :  { %6412 = vst [vmem:[#allocation43_spill] sm:$0xff] %v4622_v21  ;;  %v4624_v47 = vpop.permute.xlu1 %1580 }
 0x1ed   :  { %6413 = vst [vmem:[#allocation44_spill] sm:$0xff] %v4624_v47  ;;  %3772 = vrot.lane.b32.xlu0 %v4379_v1, %s3920_s12  ;;  %v3350_v47 = vunpack.i.h.bf16 %v4426_v19 }
 0x1ee   :  { %3767 = vrot.lane.b32.xlu1 %v4499_v54, %s3917_s0  ;;  %v4680_v54 = vpack.i.bf16 %v4170_v35, %v4145_v12  ;;  %v6425_v12 = vunpack.i.l.bf16 %v4347_v56 }
 0x1ef   :  { %v4630_v22 = vpop.permute.xlu0 %3507 }
 0x1f0   :  { %6414 = vst [vmem:[#allocation45_spill] sm:$0xff] %v4630_v22  ;;  %v4632_v49 = vpop.permute.xlu1 %3487 }
 0x1f1   :  { %6415 = vst [vmem:[#allocation46_spill] sm:$0xff] %v4632_v49  ;;  %3782 = vrot.lane.b32.xlu0 %v3681_v27, %s3918_s11  ;;  %v4651_v27 = vpack.i.bf16 %v4164_v31, %v4170_v35  ;;  %v4665_v31 = vsel %vm388_vm4, %v6419_v29, %v3350_v47  ;;  %v6422_v29 = vunpack.i.l.bf16 %v4322_v44 }
 0x1f2   :  { %3777 = vrot.lane.b32.xlu1 %v4557_v10, %s3917_s0  ;;  %6420 = vst [vmem:[#allocation50_spill] sm:$0xff] %v4665_v31 }
 0x1f3   :  { %v4637_v53 = vpop.permute.xlu0 %3522 }
 0x1f4   :  { %6416 = vst [vmem:[#allocation47_spill] sm:$0xff] %v4637_v53  ;;  %v4639_v21 = vpop.permute.xlu1 %3497  ;;  %v3200_v53 = vunpack.i.h.bf16 %v4322_v44  ;;  %v3370_v44 = vunpack.i.h.bf16 %v4454_v37 }
 0x1f5   :  { %6417 = vst [vmem:[#allocation48_spill] sm:$0xff] %v4639_v21  ;;  %3787 = vrot.lane.b32.xlu0 %v4152_v18, %s3915_s9 }
 0x1f6   :  { %3792 = vrot.lane.b32.xlu1 %v4379_v1, %s3919_s2  ;;  %v3220_v1 = vunpack.i.h.bf16 %v4347_v56  ;;  %v4685_v47 = vsel %vm388_vm4, %v6422_v29, %v3200_v53 }
 0x1f7   :  { %v4647_v22 = vpop.permute.xlu0 %3532  ;;  %6423 = vst [vmem:[#allocation52_spill] sm:$0xff] %v4685_v47  ;;  %v3235_v47 = vunpack.i.h.bf16 %v4369_v63 }
 0x1f8   :  { %v3535_v21 = vunpack.i.h.bf16 %v4647_v22  ;;  %v6283_v49 = vunpack.i.l.bf16 %v4647_v22  ;;  %v4656_v18 = vpop.permute.xlu1 %3502  ;;  %v4698_v35 = vsel %vm492_vm7, %v6425_v12, %v3220_v1  ;;  %v3240_v12 = vunpack.i.h.bf16 %v4367_v62 }
 0x1f9   :  { %6418 = vst [vmem:[#allocation49_spill] sm:$0xff] %v4656_v18  ;;  %3802 = vrot.lane.b32.xlu0 %v4651_v27, %s3912_s30  ;;  %v3204_v18 = vunpack.i.l.bf16 %v4335_v52  ;;  %6426 = vst [vmem:[#allocation54_spill] sm:$0xff] %v4698_v35  ;;  %v3215_v52 = vunpack.i.h.bf16 %v4353_v59  ;;  %v3225_v35 = vunpack.i.h.bf16 %v4361_v61  ;;  %v6429_v1 = vunpack.i.l.bf16 %v4454_v37 }
 0x1fa   :  { %v4670_v20 = vsel %vm388_vm4, %v6283_v49, %v3535_v21  ;;  %3797 = vrot.lane.b32.xlu1 %v4557_v10, %s3918_s11 }
 0x1fb   :  { %6421 = vst [vmem:[#allocation51_spill] sm:$0xff] %v4670_v20  ;;  %v4676_v25 = vpop.permute.xlu0 %3542  ;;  %v4722_v20 = vsel %vm440_vm5, %v3204_v18, %v3205_v15  ;;  %v4732_v53 = vsel %vm492_vm7, %v6429_v1, %v3370_v44  ;;  %v3344_v18 = vunpack.i.l.bf16 %v4525_v45 }
 0x1fc   :  { %v3545_v21 = vunpack.i.h.bf16 %v4676_v25  ;;  %v6288_v49 = vunpack.i.l.bf16 %v4676_v25  ;;  %v4689_v58 = vpop.permute.xlu1 %3512  ;;  %6430 = vst [vmem:[#allocation57_spill] sm:$0xff] %v4732_v53 }
 0x1fd   :  { %6424 = vst [vmem:[#allocation53_spill] sm:$0xff] %v4689_v58  ;;  %3812 = vrot.lane.b32.xlu0 %v4680_v54, %s3914_s8 }
 0x1fe   :  { %v4705_v29 = vsel %vm440_vm5, %v6288_v49, %v3545_v21  ;;  %3807 = vrot.lane.b32.xlu1 %v4230_v40, %s3914_s8  ;;  %v3345_v21 = vunpack.i.h.bf16 %v4525_v45  ;;  %v6433_v45 = vunpack.i.l.bf16 %v4367_v62 }
 0x1ff   :  { %6427 = vst [vmem:[#allocation55_spill] sm:$0xff] %v4705_v29  ;;  %v4711_v58 = vpop.permute.xlu0 %3552  ;;  %v3214_v29 = vunpack.i.l.bf16 %v4353_v59  ;;  %v3224_v59 = vunpack.i.l.bf16 %v4361_v61 }
 0x200   :  { %v3555_v31 = vunpack.i.h.bf16 %v4711_v58  ;;  %v4719_v49 = vpop.permute.xlu1 %3517  ;;  %v4753_v38 = vsel %vm596_vm8, %v6433_v45, %v3240_v12  ;;  %v392_v12 = vsel %vm388_vm4, %v3344_v18, %v3345_v21  ;;  %v3354_v45 = vunpack.i.l.bf16 %v4532_v26 }
 0x201   :  { %6428 = vst [vmem:[#allocation56_spill] sm:$0xff] %v4719_v49  ;;  %3822 = vrot.lane.b32.xlu0 %v4222_v39, %s3916_s10  ;;  %v6431_v49 = vunpack.i.l.bf16 %v4711_v58  ;;  %6434 = vst [vmem:[#allocation59_spill] sm:$0xff] %v4753_v38  ;;  %v6437_v26 = vunpack.i.l.bf16 %v4647_v22  ;;  %v6439_v22 = vunpack.i.l.bf16 %v4330_v50  ;;  %v3260_v50 = vunpack.i.h.bf16 %v4387_v4 }
 0x202   :  { %3817 = vrot.lane.b32.xlu1 %v4312_v43, %s3914_s8 }
 0x203   :  { %v4739_v34 = vsel %vm492_vm7, %v6431_v49, %v3555_v31  ;;  %v4748_v1 = vpop.permute.xlu0 %3562  ;;  %v3234_v49 = vunpack.i.l.bf16 %v4369_v63 }
 0x204   :  { %6432 = vst [vmem:[#allocation58_spill] sm:$0xff] %v4739_v34  ;;  %v3565_v31 = vunpack.i.h.bf16 %v4748_v1  ;;  %v6303_v61 = vunpack.i.l.bf16 %v4748_v1  ;;  %v3528_v3 = vpop.permute.xlu1 %3527  ;;  %v6436_v34 = vunpack.i.l.bf16 %v4426_v19  ;;  %v3244_v19 = vunpack.i.l.bf16 %v4381_v2 }
 0x205   :  { %v3530_v44 = vunpack.i.h.bf16 %v3528_v3  ;;  %v3529_v53 = vunpack.i.l.bf16 %v3528_v3  ;;  %3832 = vrot.lane.b32.xlu0 %v4557_v10, %s3915_s9  ;;  %v493_v3 = vsel %vm492_vm7, %v3214_v29, %v3215_v52  ;;  %v444_v2 = vsel %vm440_vm5, %v3354_v45, %v3355_v11 }
 0x206   :  { %v4767_v63 = vsel %vm544_vm6, %v6303_v61, %v3565_v31  ;;  %3827 = vrot.lane.b32.xlu1 %v4191_v28, %s3916_s10  ;;  %v393_v0 = vsel %vm388_vm4, %v3345_v21, %v6436_v34  ;;  %v6438_v31 = vunpack.i.l.bf16 %v4435_v24  ;;  %v6440_v24 = vunpack.i.l.bf16 %v4347_v56 }
 0x207   :  { %6435 = vst [vmem:[#allocation60_spill] sm:$0xff] %v4767_v63  ;;  %v395_v10 = vsel %vm388_vm4, %v3529_v53, %v3530_v44  ;;  %v4777_v18 = vpop.permute.xlu0 %3572  ;;  %v396_v48 = vsel %vm388_vm4, %v3530_v44, %v6437_v26  ;;  %v442_v44 = vsel %vm440_vm5, %v3205_v15, %v6439_v22  ;;  %v3259_v15 = vunpack.i.l.bf16 %v4387_v4 }
 0x208   :  { %v445_v61 = vsel %vm440_vm5, %v3355_v11, %v6438_v31  ;;  %v2901_v34 = vpack.c.bf16 %v395_v10, %v392_v12  ;;  %v3538_v21 = vpop.permute.xlu1 %3537  ;;  %v2899_v33 = vpack.c.bf16 %v396_v48, %v393_v0  ;;  %v494_v26 = vsel %vm492_vm7, %v3215_v52, %v6440_v24 }
 0x209   :  { %v3540_v53 = vunpack.i.h.bf16 %v3538_v21  ;;  %3842 = vrot.lane.b32.xlu0 %v4230_v40, %s3920_s12  ;;  %v4797_v31 = vsel %vm544_vm6, %v3224_v59, %v3225_v35  ;;  %v3539_v48 = vunpack.i.l.bf16 %v3538_v21  ;;  %v2903_v29 = vpack.c.bf16 %v445_v61, %v442_v44 }
 0x20a   :  { %3837 = vrot.lane.b32.xlu1 %v4651_v27, %s3916_s10  ;;  %2900 = vmatprep.subr.bf16.mxu0 %v2899_v33  ;;  %v6441_v52 = vunpack.i.l.bf16 %v4676_v25  ;;  %v6442_v12 = vunpack.i.l.bf16 %v4359_v60  ;;  %v4815_v45 = vsel %vm596_vm8, %v3234_v49, %v3235_v47  ;;  %v4818_v33 = vsel %vm648_vm9, %v3244_v19, %v3245_v42 }
 0x20b   :  { %2902 = vmatpush1.bf16.msra.mxu0 %v2901_v34  ;;  %v4804_v56 = vpop.permute.xlu0 %3582  ;;  %v6443_v61 = vunpack.i.l.bf16 %v4367_v62  ;;  %v4826_v60 = vsel %vm648_vm9, %v3249_v23, %v3250_v32  ;;  %v2905_v0 = vpack.c.bf16 %v444_v2, %v4722_v20  ;;  %v4833_v10 = vsel %vm648_vm9, %v3245_v42, %v3249_v23 }
 0x20c   :  { %v448_v59 = vsel %vm440_vm5, %v3540_v53, %v6441_v52  ;;  %v4812_v11 = vsel %vm544_vm6, %v3225_v35, %v6442_v12  ;;  %v3548_v4 = vpop.permute.xlu1 %3547  ;;  %2904 = vmatprep.subr.bf16.mxu0 %v2903_v29  ;;  %v3365_v35 = vunpack.i.h.bf16 %v4540_v30  ;;  %v3255_v62 = vunpack.i.h.bf16 %v4389_v5 }
 0x20d   :  { %v4823_v25 = vsel %vm596_vm8, %v3235_v47, %v6443_v61  ;;  %v3550_v49 = vunpack.i.h.bf16 %v3548_v4  ;;  %3852 = vrot.lane.b32.xlu0 %v4680_v54, %s3920_s12  ;;  %v447_v47 = vsel %vm440_vm5, %v3539_v48, %v3540_v53  ;;  %v3549_v19 = vunpack.i.l.bf16 %v3548_v4 }
 0x20e   :  { %3847 = vrot.lane.b32.xlu1 %v4236_v41, %s3906_s24  ;;  %v2907_v32 = vpack.c.bf16 %v494_v26, %v448_v59  ;;  %v3254_v34 = vunpack.i.l.bf16 %v4389_v5  ;;  %v3375_v21 = vunpack.i.h.bf16 %v4548_v57  ;;  %v6444_v20 = vunpack.i.l.bf16 %v4711_v58 }
 0x20f   :  { %2906 = vmatpush1.bf16.msra.mxu0 %v2905_v0  ;;  %v4841_v54 = vpop.permute.xlu0 %3592  ;;  %v4847_v23 = vsel %vm700_vm10, %v3259_v15, %v3260_v50  ;;  %v3270_v53 = vunpack.i.h.bf16 %v4395_v6  ;;  %v3269_v22 = vunpack.i.l.bf16 %v4395_v6  ;;  %v3265_v44 = vunpack.i.h.bf16 %v4397_v7 }
 0x210   :  { %v500_v42 = vsel %vm492_vm7, %v3550_v49, %v6444_v20  ;;  %v3364_v5 = vunpack.i.l.bf16 %v4540_v30  ;;  %v3558_v24 = vpop.permute.xlu1 %3557  ;;  %2908 = vmatprep.subr.bf16.mxu0 %v2907_v32  ;;  %v3264_v26 = vunpack.i.l.bf16 %v4397_v7  ;;  %v6308_v2 = vunpack.i.h.bf16 %v4403_v8 }
 0x211   :  { %v2909_v58 = vpack.c.bf16 %v493_v3, %v447_v47  ;;  %1478 = vrot.lane.b32.xlu0 %v4173_v36, %s3906_s24  ;;  %v6445_v48 = vunpack.i.l.bf16 %v4454_v37  ;;  %v6309_v6 = vunpack.i.l.bf16 %v4403_v8  ;;  %v3374_v50 = vunpack.i.l.bf16 %v4548_v57 }
 0x212   :  { %v499_v30 = vsel %vm492_vm7, %v3549_v19, %v3550_v49  ;;  %3857 = vrot.lane.b32.xlu1 %v4312_v43, %s3920_s12  ;;  %v6307_v52 = vunpack.i.h.bf16 %v4405_v9  ;;  %v6317_v3 = vunpack.i.l.bf16 %v4405_v9  ;;  %v3560_v59 = vunpack.i.h.bf16 %v3558_v24 }
 0x213   :  { %v497_v29 = vsel %vm492_vm7, %v3365_v35, %v6445_v48  ;;  %2910 = vmatpush1.bf16.msra.mxu0 %v2909_v58  ;;  %v4867_v12 = vpop.permute.xlu0 %3612  ;;  %v6446_v37 = vunpack.i.l.bf16 %v4465_v51  ;;  %v4873_v57 = vsel %vm700_vm10, %v3254_v34, %v3255_v62  ;;  %v6306_v61 = vunpack.i.h.bf16 %v4414_v14 }
 0x214   :  { %v2911_v7 = vpack.c.bf16 %v500_v42, %v497_v29  ;;  %v6316_v43 = vunpack.i.l.bf16 %v4414_v14  ;;  %v496_v49 = vsel %vm492_vm7, %v3364_v5, %v3365_v35  ;;  %v3568_v0 = vpop.permute.xlu1 %3567  ;;  %v4879_v47 = vsel %vm752_vm11, %v3264_v26, %v3265_v44 }
 0x215   :  { %v549_v4 = vsel %vm544_vm6, %v3375_v21, %v6446_v37  ;;  %v2913_v19 = vpack.c.bf16 %v499_v30, %v496_v49  ;;  %3867 = vrot.lane.b32.xlu0 %v4222_v39, %s3919_s2  ;;  %v4884_v51 = vsel %vm700_vm10, %v3255_v62, %v3259_v15  ;;  %v4887_v32 = vsel %vm752_vm11, %v3269_v22, %v3270_v53  ;;  %v6448_v49 = vld [vmem:[#allocation30_spill] sm:$0xff] }
 0x216   :  { %2912 = vmatprep.subr.bf16.mxu0 %v2911_v7  ;;  %v548_v34 = vsel %vm544_vm6, %v3374_v50, %v3375_v21  ;;  %v3559_v20 = vunpack.i.l.bf16 %v3558_v24  ;;  %3862 = vrot.lane.b32.xlu1 %v4236_v41, %s3908_s26  ;;  %v2915_v35 = vpack.c.bf16 %v549_v4, %v4812_v11  ;;  %v4894_v42 = vsel %vm752_vm11, %v3265_v44, %v3269_v22 }
 0x217   :  { %v3570_v5 = vunpack.i.h.bf16 %v3568_v0  ;;  %2914 = vmatpush1.bf16.msra.mxu0 %v2913_v19  ;;  %v4896_v39 = vpop.permute.xlu0 %3622  ;;  %v6447_v15 = vunpack.i.l.bf16 %v4748_v1  ;;  %v4906_v21 = vsel %vm1480_vm12, %v6317_v3, %v6307_v52  ;;  %v4913_v11 = vsel %vm804_vm13, %v6309_v6, %v6308_v2  ;;  %v6452_v6 = vld [vmem:[#allocation25_spill] sm:$0xff] }
 0x218   :  { %v4918_v44 = vpop.permute.xlu1 %3577  ;;  %2916 = vmatprep.subr.bf16.mxu0 %v2915_v35  ;;  %v4925_v24 = vsel %vm1532_vm14, %v6316_v43, %v6306_v61  ;;  %v3385_v58 = vunpack.i.h.bf16 %v4559_v55  ;;  %v6310_v48 = vunpack.i.l.bf16 %v4777_v18  ;;  %v2917_v29 = vpack.c.bf16 %v548_v34, %v4797_v31  ;;  %v6449_v34 = vld [vmem:[#allocation17_spill] sm:$0xff] }
 0x219   :  { %v552_v62 = vsel %vm544_vm6, %v3560_v59, %v6447_v15  ;;  %1530 = vrot.lane.b32.xlu0 %v4173_v36, %s3908_s26  ;;  %v551_v30 = vsel %vm544_vm6, %v3559_v20, %v3560_v59  ;;  %v3569_v7 = vunpack.i.l.bf16 %v3568_v0  ;;  %v6311_v4 = vunpack.i.l.bf16 %v4484_v46  ;;  %v6450_v0 = vld [vmem:[#allocation18_spill] sm:$0xff] }
 0x21a   :  { %3872 = vrot.lane.b32.xlu1 %v4191_v28, %s3919_s2  ;;  %v2919_v37 = vpack.c.bf16 %v4823_v25, %v552_v62  ;;  %v3395_v19 = vunpack.i.h.bf16 %v6448_v49  ;;  %v604_v31 = vsel %vm596_vm8, %v3570_v5, %v6310_v48  ;;  %v6315_v20 = vunpack.i.l.bf16 %v6450_v0  ;;  %v6451_v62 = vld [vmem:[#allocation24_spill] sm:$0xff] }
 0x21b   :  { %2918 = vmatpush1.bf16.msra.mxu0 %v2917_v29  ;;  %v4940_v35 = vpop.permute.xlu0 %3637  ;;  %v3384_v28 = vunpack.i.l.bf16 %v4559_v55  ;;  %v3394_v25 = vunpack.i.l.bf16 %v6448_v49  ;;  %v6312_v29 = vunpack.i.h.bf16 %v6451_v62  ;;  %v3424_v61 = vunpack.i.l.bf16 %v6451_v62  ;;  %v6510_v62 = vld [vmem:[#allocation43_spill] sm:$0xff] }
 0x21c   :  { %v4949_v15 = vpop.permute.xlu1 %3587  ;;  %2920 = vmatprep.subr.bf16.mxu0 %v2919_v37  ;;  %v2921_v52 = vpack.c.bf16 %v4815_v45, %v551_v30  ;;  %v601_v2 = vsel %vm596_vm8, %v3385_v58, %v6311_v4  ;;  %v6313_v55 = vunpack.i.h.bf16 %v6452_v6  ;;  %v3429_v49 = vunpack.i.l.bf16 %v6452_v6  ;;  %v6453_v45 = vld [vmem:[#allocation20_spill] sm:$0xff]  ;;  %v6505_v6 = vld [vmem:[#allocation46_spill] sm:$0xff] }
 0x21d   :  { %3882 = vrot.lane.b32.xlu0 %v4230_v40, %s3915_s9  ;;  %v603_v48 = vsel %vm596_vm8, %v3569_v7, %v3570_v5  ;;  %v2923_v37 = vpack.c.bf16 %v604_v31, %v601_v2  ;;  %v3580_v40 = vunpack.i.h.bf16 %v4918_v44  ;;  %v653_v4 = vsel %vm648_vm9, %v3395_v19, %v6315_v20  ;;  %v6454_v31 = vld [vmem:[#allocation22_spill] sm:$0xff] }
 0x21e   :  { %3877 = vrot.lane.b32.xlu1 %v4651_v27, %s3919_s2  ;;  %v600_v1 = vsel %vm596_vm8, %v3384_v28, %v3385_v58  ;;  %v652_v5 = vsel %vm648_vm9, %v3394_v25, %v3395_v19  ;;  %v6314_v27 = vunpack.i.l.bf16 %v4940_v35  ;;  %v1433_v58 = vsel %vm1428_vm15, %v3424_v61, %v6312_v29  ;;  %v6458_v29 = vld [vmem:[#allocation32_spill] sm:$0xff] }
 0x21f   :  { %2922 = vmatpush1.bf16.msra.mxu0 %v2921_v52  ;;  %v4967_v22 = vpop.permute.xlu0 %3647  ;;  %v6318_v52 = vunpack.i.l.bf16 %v4804_v56  ;;  %v2925_v50 = vpack.c.bf16 %v603_v48, %v600_v1  ;;  %v3579_v19 = vunpack.i.l.bf16 %v4918_v44  ;;  %v2927_v25 = vpack.c.bf16 %v653_v4, %v4833_v10  ;;  %v6456_v44 = vld [vmem:[#allocation35_spill] sm:$0xff] }
 0x220   :  { %v3649_v2 = vunpack.i.l.bf16 %v4967_v22  ;;  %v4976_v7 = vpop.permute.xlu1 %3597  ;;  %2924 = vmatprep.subr.bf16.mxu0 %v2923_v37  ;;  %v5000_v1 = vsel %vm1480_vm12, %v3429_v49, %v6313_v55  ;;  %v3479_v48 = vunpack.i.l.bf16 %v6456_v44  ;;  %v3590_v37 = vunpack.i.h.bf16 %v4949_v15 }
 0x221   :  { %1582 = vrot.lane.b32.xlu0 %v4173_v36, %s3910_s28  ;;  %v1873_v36 = vld [vmem:[%s6244_s5 + $0x8] sm:$0xff]  ;;  %v2929_v10 = vpack.c.bf16 %v652_v5, %v4818_v33  ;;  %v656_v4 = vsel %vm648_vm9, %v3580_v40, %v6318_v52  ;;  %v3405_v55 = vunpack.i.h.bf16 %v6458_v29  ;;  %v6319_v43 = vunpack.i.h.bf16 %v4940_v35 }
 0x222   :  { %v4989_v28 = vsel %vm1116_vm0, %v3649_v2, %v6314_v27  ;;  %3887 = vrot.lane.b32.xlu1 %v4236_v41, %s3910_s28  ;;  %v1872_v41 = vld [vmem:[%s6244_s5] sm:$0xff]  ;;  %v6459_v27 = vld [vmem:[#allocation34_spill] sm:$0xff]  ;;  %v3480_v3 = vunpack.i.h.bf16 %v6456_v44  ;;  %v6321_v53 = vunpack.i.l.bf16 %v4841_v54  ;;  %v655_v52 = vsel %vm648_vm9, %v3579_v19, %v3580_v40 }
 0x223   :  { %6455 = vst [vmem:[#allocation30_spill] sm:$0xff] %v4989_v28  ;;  %2926 = vmatpush1.bf16.msra.mxu0 %v2925_v50  ;;  %v5004_v2 = vpop.permute.xlu0 %3662  ;;  %v3589_v20 = vunpack.i.l.bf16 %v4949_v15  ;;  %v1875_v44 = vld [vmem:[%s6244_s5 + $0x18] sm:$0xff]  ;;  %v1432_v59 = vsel %vm1428_vm15, %v3479_v48, %v3424_v61  ;;  %v1874_v15 = vld [vmem:[%s6244_s5 + $0x10] sm:$0xff]  ;;  %vm856_vm4 = vcmask 719872   ;;  %vm1168_vm5 = vcmask 547840  }
 0x224   :  { %6457 = vst [vmem:[#allocation17_spill] sm:$0xff] %v5004_v2  ;;  %v3665_v50 = vunpack.i.h.bf16 %v5004_v2  ;;  %v5017_v26 = vpop.permute.xlu1 %3602  ;;  %2928 = vmatprep.subr.bf16.mxu0 %v2927_v25  ;;  %v2931_v25 = vpack.c.bf16 %v4884_v51, %v656_v4  ;;  %v708_v51 = vsel %vm700_vm10, %v3590_v37, %v6321_v53  ;;  %v3023_v53 = vpack.c.bf16 %v5000_v1, %v4906_v21 }
 0x225   :  { %6460 = vst [vmem:[#allocation18_spill] sm:$0xff] %v5017_v26  ;;  %v6320_v33 = vunpack.i.h.bf16 %v5017_v26  ;;  %v3604_v5 = vunpack.i.l.bf16 %v5017_v26  ;;  %1886 = vperm.xlu0 %3189, %v1873_v36   ;;  %v6326_v1 = vunpack.i.l.bf16 %v4421_v17  ;;  %vm960_vm6 = vcmask 703488  }
 0x226   :  { %v5028_v30 = vsel %vm1116_vm0, %v6319_v43, %v3665_v50  ;;  %1881 = vperm.xlu1 %3190, %v1872_v41   ;;  %v6462_v41 = vunpack.i.h.bf16 %v6449_v34  ;;  %v3414_v50 = vunpack.i.l.bf16 %v6459_v27  ;;  %v2933_v43 = vpack.c.bf16 %v4873_v57, %v655_v52  ;;  %v1877_v57 = vld [vmem:[%s6244_s5 + $0x28] sm:$0xff] }
 0x227   :  { %6461 = vst [vmem:[#allocation20_spill] sm:$0xff] %v5028_v30  ;;  %v1435_v36 = vsel %vm1428_vm15, %v3480_v3, %v3604_v5  ;;  %2930 = vmatpush1.bf16.msra.mxu0 %v2929_v10  ;;  %v5036_v40 = vpop.permute.xlu0 %3672  ;;  %v1436_v19 = vsel %vm1428_vm15, %v3604_v5, %v6320_v33  ;;  %v3404_v3 = vunpack.i.l.bf16 %v6458_v29  ;;  %v6463_v5 = vunpack.i.l.bf16 %v6453_v45 }
 0x228   :  { %v1484_v61 = vsel %vm1480_vm12, %v6462_v41, %v3429_v49  ;;  %v3021_v48 = vpack.c.bf16 %v1435_v36, %v1432_v59  ;;  %v5051_v10 = vpop.permute.xlu1 %3607  ;;  %2932 = vmatprep.subr.bf16.mxu0 %v2931_v25  ;;  %v3019_v4 = vpack.c.bf16 %v1436_v19, %v1433_v58  ;;  %v6464_v59 = vld [vmem:[#allocation36_spill] sm:$0xff]  ;;  %v707_v49 = vsel %vm700_vm10, %v3589_v20, %v3590_v37  ;;  %v6468_v20 = vld [vmem:[#allocation10_spill] sm:$0xff] }
 0x229   :  { %1896 = vperm.xlu0 %3189, %v1875_v44   ;;  %v705_v33 = vsel %vm700_vm10, %v3405_v55, %v6463_v5  ;;  %v3434_v29 = vunpack.i.l.bf16 %v6464_v59  ;;  %v6465_v52 = vunpack.i.l.bf16 %v6454_v31  ;;  %v6466_v25 = vunpack.i.h.bf16 %v6459_v27  ;;  %v6467_v44 = vld [vmem:[#allocation9_spill] sm:$0xff] }
 0x22a   :  { %1891 = vperm.xlu1 %3190, %v1874_v15   ;;  %3020 = vmatprep.subr.bf16.mxu1 %v3019_v4  ;;  %v2935_v58 = vpack.c.bf16 %v708_v51, %v705_v33  ;;  %v1876_v15 = vld [vmem:[%s6244_s5 + $0x20] sm:$0xff]  ;;  %v6470_v51 = vunpack.i.l.bf16 %v4405_v9  ;;  %v6471_v41 = vunpack.i.l.bf16 %v6449_v34  ;;  %v704_v5 = vsel %vm700_vm10, %v3404_v3, %v3405_v55 }
 0x22b   :  { %v757_v21 = vsel %vm752_vm11, %v6466_v25, %v6465_v52  ;;  %2934 = vmatpush1.bf16.msra.mxu0 %v2933_v43  ;;  %3022 = vmatpush1.bf16.msra.mxu1 %v3021_v48  ;;  %v5074_v33 = vpop.permute.xlu0 %3677  ;;  %v6472_v48 = vunpack.i.h.bf16 %v6459_v27  ;;  %v2937_v19 = vpack.c.bf16 %v707_v49, %v704_v5  ;;  %vm1220_vm7 = vcmask 539648  }
 0x22c   :  { %6469 = vst [vmem:[#allocation22_spill] sm:$0xff] %v5074_v33  ;;  %v1481_v4 = vsel %vm1480_vm12, %v6471_v41, %v6470_v51  ;;  %v6322_v52 = vunpack.i.h.bf16 %v5074_v33  ;;  %v3679_v25 = vunpack.i.l.bf16 %v5074_v33  ;;  %v5087_v43 = vpop.permute.xlu1 %3617  ;;  %2936 = vmatprep.subr.bf16.mxu0 %v2935_v58  ;;  %3024 = vmatprep.subr.bf16.mxu1 %v3023_v53  ;;  %v2939_v51 = vpack.c.bf16 %v757_v21, %v4894_v42  ;;  %v6474_v41 = vld [vmem:[#allocation42_spill] sm:$0xff]  ;;  %v6475_v58 = vld [vmem:[#allocation37_spill] sm:$0xff] }
 0x22d   :  { %v756_v37 = vsel %vm752_vm11, %v3414_v50, %v6472_v48  ;;  %1906 = vperm.xlu0 %3189, %v1877_v57   ;;  %v3025_v34 = vpack.c.bf16 %v1484_v61, %v1481_v4  ;;  %v6473_v55 = vunpack.i.l.bf16 %v4414_v14  ;;  %v3485_v36 = vunpack.i.h.bf16 %v6474_v41  ;;  %v6476_v50 = vld [vmem:[#allocation26_spill] sm:$0xff] }
 0x22e   :  { %v1487_v53 = vsel %vm1480_vm12, %v6475_v58, %v3679_v25  ;;  %1901 = vperm.xlu1 %3190, %v1876_v15   ;;  %v1488_v27 = vsel %vm1480_vm12, %v3679_v25, %v6322_v52  ;;  %v6325_v49 = vunpack.i.h.bf16 %v6476_v50  ;;  %v3439_v61 = vunpack.i.l.bf16 %v6476_v50  ;;  %v6479_v58 = vld [vmem:[#allocation39_spill] sm:$0xff] }
 0x22f   :  { %v1533_v3 = vsel %vm1532_vm14, %v3434_v29, %v6473_v55  ;;  %2938 = vmatpush1.bf16.msra.mxu0 %v2937_v19  ;;  %3026 = vmatpush1.bf16.msra.mxu1 %v3025_v34  ;;  %v5104_v57 = vpop.permute.xlu0 %3682  ;;  %v1878_v29 = vld [vmem:[%s6244_s5 + $0x30] sm:$0x3]  ;;  %v3027_v21 = vpack.c.bf16 %v4925_v24, %v1488_v27  ;;  %v3435_v15 = vunpack.i.h.bf16 %v6464_v59  ;;  %v6324_v4 = vunpack.i.l.bf16 %v6474_v41  ;;  %v6480_v55 = vld [vmem:[#allocation14_spill] sm:$0xff] }
 0x230   :  { %v3029_v42 = vpack.c.bf16 %v1533_v3, %v1487_v53  ;;  %6477 = vst [vmem:[#allocation35_spill] sm:$0xff] %v5104_v57  ;;  %v3685_v5 = vunpack.i.h.bf16 %v5104_v57  ;;  %v6323_v25 = vunpack.i.l.bf16 %v5104_v57  ;;  %v5114_v48 = vpop.permute.xlu1 %3627  ;;  %2940 = vmatprep.subr.bf16.mxu0 %v2939_v51  ;;  %v6478_v34 = vld [vmem:[#allocation13_spill] sm:$0xff]  ;;  %v3400_v3 = vunpack.i.h.bf16 %v6450_v0 }
 0x231   :  { %3028 = vmatprep.subr.bf16.mxu1 %v3027_v21  ;;  %v2941_v24 = vpack.c.bf16 %v756_v37, %v4879_v47  ;;  %v1536_v59 = vsel %vm1532_vm14, %v3485_v36, %v3435_v15  ;;  %v3315_v21 = vunpack.i.h.bf16 %v6480_v55  ;;  %v1589_v36 = vsel %vm1584_vm1, %v3439_v61, %v6325_v49 }
 0x232   :  { %v1539_v53 = vsel %vm1532_vm14, %v6479_v58, %v3685_v5  ;;  %1911 = vperm.xlu1 %3190, %v1878_v29   ;;  %v1537_v27 = vsel %vm1532_vm14, %v3435_v15, %v6323_v25  ;;  %v1540_v51 = vsel %vm1532_vm14, %v3685_v5, %v6324_v4  ;;  %v6481_v29 = vld [vmem:[#allocation19_spill] sm:$0xff]  ;;  %v3390_v4 = vunpack.i.h.bf16 %v4484_v46 }
 0x233   :  { %v3033_v19 = vpack.c.bf16 %v1539_v53, %v1536_v59  ;;  %2942 = vmatpush1.bf16.msra.mxu0 %v2941_v24  ;;  %3030 = vmatpush1.bf16.msra.mxu1 %v3029_v42  ;;  %v1579_v47 = vpop.permute.xlu0 %1578  ;;  %v3330_v15 = vunpack.i.h.bf16 %v6481_v29  ;;  %v3329_v58 = vunpack.i.l.bf16 %v6481_v29  ;;  %v3031_v5 = vpack.c.bf16 %v1540_v51, %v1537_v27 }
 0x234   :  { %v5137_v25 = vpop.permute.xlu1 %3632  ;;  %v6483_v59 = vunpack.i.h.bf16 %v4421_v17  ;;  %v6484_v24 = vunpack.i.h.bf16 %v4412_v13  ;;  %v6485_v53 = vunpack.i.l.bf16 %v4412_v13  ;;  %v6486_v29 = vunpack.i.h.bf16 %v4419_v16 }
 0x235   :  { %6482 = vst [vmem:[#allocation32_spill] sm:$0xff] %v5137_v25  ;;  %v6487_v37 = vunpack.i.l.bf16 %v4419_v16  ;;  %v1588_v51 = vsel %vm1584_vm1, %v3330_v15, %v3439_v61  ;;  %3032 = vmatprep.subr.bf16.mxu1 %v3031_v5  ;;  %v6490_v50 = vunpack.i.h.bf16 %v6467_v44  ;;  %v3420_v57 = vunpack.i.h.bf16 %v6454_v31 }
 0x236   :  { %v1586_v42 = vsel %vm1584_vm1, %v6326_v1, %v6483_v59  ;;  %v5150_v49 = vsel %vm908_vm2, %v6485_v53, %v6484_v24  ;;  %v6489_v59 = vunpack.i.l.bf16 %v6450_v0  ;;  %v6491_v24 = vunpack.i.l.bf16 %v6467_v44 }
 0x237   :  { %v5157_v27 = vsel %vm1012_vm3, %v6487_v37, %v6486_v29  ;;  %v3035_v52 = vpack.c.bf16 %v1589_v36, %v1586_v42  ;;  %v6492_v37 = vld [vmem:[#allocation27_spill] sm:$0xff]  ;;  %v3575_v61 = vunpack.i.h.bf16 %v4777_v18  ;;  %3034 = vmatpush1.bf16.msra.mxu1 %v3033_v19  ;;  %v5175_v36 = vpop.permute.xlu0 %3697  ;;  %v6494_v0 = vunpack.i.h.bf16 %v6468_v20 }
 0x238   :  { %6488 = vst [vmem:[#allocation34_spill] sm:$0xff] %v5157_v27  ;;  %v5163_v1 = vsel %vm648_vm9, %v6489_v59, %v3400_v3  ;;  %v5170_v53 = vsel %vm856_vm4, %v6491_v24, %v6490_v50  ;;  %v3449_v29 = vunpack.i.l.bf16 %v6492_v37  ;;  %6493 = vst [vmem:[#allocation36_spill] sm:$0xff] %v5175_v36  ;;  %v6495_v3 = vunpack.i.l.bf16 %v6468_v20  ;;  %v5188_v59 = vpop.permute.xlu1 %3642  ;;  %v6515_v20 = vld [vmem:[#allocation41_spill] sm:$0xff]  ;;  %v6517_v36 = vld [vmem:[#allocation31_spill] sm:$0xff] }
 0x239   :  { %v6496_v5 = vunpack.i.l.bf16 %v4421_v17  ;;  %6497 = vst [vmem:[#allocation9_spill] sm:$0xff] %v5188_v59  ;;  %3036 = vmatprep.subr.bf16.mxu1 %v3035_v52  ;;  %v6498_v19 = vunpack.i.h.bf16 %v6478_v34  ;;  %v6499_v24 = vunpack.i.l.bf16 %v6478_v34  ;;  %v6500_v14 = vunpack.i.l.bf16 %v6480_v55 }
 0x23a   :  { %v5182_v15 = vsel %vm1168_vm5, %v6495_v3, %v6494_v0  ;;  %v6502_v3 = vld [vmem:[#allocation21_spill] sm:$0xff]  ;;  %v3043_v52 = vpack.c.bf16 %v5163_v1, %v4826_v60  ;;  %v3410_v33 = vunpack.i.h.bf16 %v6453_v45  ;;  %v3490_v26 = vunpack.i.h.bf16 %v6505_v6 }
 0x23b   :  { %v1585_v50 = vsel %vm1584_vm1, %v3329_v58, %v6496_v5  ;;  %v5195_v41 = vsel %vm960_vm6, %v6499_v24, %v6498_v19  ;;  %v5200_v0 = vsel %vm1220_vm7, %v6500_v14, %v3315_v21  ;;  %v3335_v17 = vunpack.i.h.bf16 %v6502_v3  ;;  %v6504_v24 = vld [vmem:[#allocation23_spill] sm:$0xff]  ;;  %v5215_v21 = vpop.permute.xlu0 %3702 }
 0x23c   :  { %6501 = vst [vmem:[#allocation37_spill] sm:$0xff] %v5200_v0  ;;  %v3037_v58 = vpack.c.bf16 %v1588_v51, %v1585_v50  ;;  %v6503_v5 = vunpack.i.l.bf16 %v4484_v46  ;;  %v3334_v19 = vunpack.i.l.bf16 %v6502_v3  ;;  %v3339_v9 = vunpack.i.l.bf16 %v6504_v24  ;;  %v6506_v46 = vld [vmem:[#allocation44_spill] sm:$0xff]  ;;  %v6509_v3 = vld [vmem:[#allocation38_spill] sm:$0xff]  ;;  %v5230_v55 = vpop.permute.xlu1 %3652 }
 0x23d   :  { %v5213_v14 = vsel %vm856_vm4, %v3335_v17, %v3449_v29  ;;  %v6507_v51 = vunpack.i.l.bf16 %v4777_v18  ;;  %v6508_v1 = vunpack.i.l.bf16 %v6454_v31  ;;  %v3494_v17 = vunpack.i.l.bf16 %v6510_v62  ;;  %6511 = vst [vmem:[#allocation13_spill] sm:$0xff] %v5230_v55  ;;  %v6514_v31 = vld [vmem:[#allocation29_spill] sm:$0xff] }
 0x23e   :  { %v602_v42 = vsel %vm596_vm8, %v6503_v5, %v3390_v4  ;;  %3038 = vmatpush1.bf16.msra.mxu1 %v3037_v58  ;;  %v1592_v4 = vsel %vm1584_vm1, %v1579_v47, %v6506_v46  ;;  %v6342_v5 = vunpack.i.h.bf16 %v6509_v3  ;;  %v6512_v46 = vunpack.i.h.bf16 %v6492_v37  ;;  %v1616_v58 = vld [vmem:[%s6243_s4 + $0x20] sm:$0xff] }
 0x23f   :  { %v605_v60 = vsel %vm596_vm8, %v6507_v51, %v3575_v61  ;;  %v5225_v50 = vsel %vm752_vm11, %v6508_v1, %v3420_v57  ;;  %2169 = vmatprep.subr.mxu1 %v1592_v4  ;;  %v6513_v61 = vld [vmem:[#allocation28_spill] sm:$0xff]  ;;  %v3460_v30 = vunpack.i.h.bf16 %v6514_v31  ;;  %v3585_v1 = vunpack.i.h.bf16 %v4804_v56  ;;  %v5260_v0 = vpop.permute.xlu0 %3707 }
 0x240   :  { %v5235_v18 = vsel %vm856_vm4, %v3449_v29, %v6512_v46  ;;  %v3454_v51 = vunpack.i.l.bf16 %v6513_v61  ;;  %v5247_v4 = vsel %vm804_vm13, %v3490_v26, %v6342_v5  ;;  %v1591_v29 = vsel %vm1584_vm1, %v6515_v20, %v1579_v47  ;;  %v6533_v5 = vld [vmem:[#allocation33_spill] sm:$0xff] }
 0x241   :  { %v6516_v46 = vunpack.i.h.bf16 %v5215_v21  ;;  %v3039_v57 = vpack.c.bf16 %v605_v60, %v602_v42  ;;  %v3464_v55 = vunpack.i.l.bf16 %v6517_v36  ;;  %v6518_v26 = vunpack.i.l.bf16 %v6453_v45 }
 0x242   :  { %2170 = vmatpush1.msra.mxu1 %v1591_v29  ;;  %v6519_v47 = vunpack.i.l.bf16 %v6467_v44  ;;  %v3340_v42 = vunpack.i.h.bf16 %v6504_v24  ;;  %v6520_v60 = vunpack.i.l.bf16 %v6478_v34  ;;  %v5278_v29 = vpop.permute.xlu1 %3657  ;;  %v6526_v24 = vunpack.i.l.bf16 %v4804_v56 }
 0x243   :  { %v5254_v28 = vsel %vm804_vm13, %v3494_v17, %v6516_v46  ;;  %v5265_v20 = vsel %vm700_vm10, %v6518_v26, %v3410_v33  ;;  %6522 = vst [vmem:[#allocation19_spill] sm:$0xff] %v5278_v29  ;;  %3040 = vmatprep.subr.bf16.mxu1 %v3039_v57  ;;  %2645 = vmatmul.mubr.msk.f32.vlgmr.msra.gmra.mrb[6].mxu1 %vm856_vm4, %v1616_v58  ;;  %v3595_v33 = vunpack.i.h.bf16 %v4841_v54  ;;  %v6523_v26 = vld [vmem:[#allocation4_spill] sm:$0xff]  ;;  %v3444_v45 = vunpack.i.l.bf16 %v6509_v3  ;;  %v5315_v27 = vpop.permute.xlu0 %3722 }
 0x244   :  { %v5270_v17 = vsel %vm856_vm4, %v3334_v19, %v6519_v47  ;;  %v5276_v46 = vsel %vm960_vm6, %v3339_v9, %v6520_v60  ;;  %v6524_v19 = vld [vmem:[#allocation3_spill] sm:$0xff]  ;;  %v657_v59 = vsel %vm648_vm9, %v6526_v24, %v3585_v1  ;;  %v6527_v9 = vmov 0.0   ;;  %v1621_v57 = vld [vmem:[%s6243_s4 + $0x48] sm:$0xff]  ;;  %v6530_v1 = vld [vmem:[#allocation49_spill] sm:$0xff] }
 0x245   :  { %6521 = vst [vmem:[#allocation39_spill] sm:$0xff] %v5276_v46  ;;  %v6525_v47 = vpack.c.bf16 %v6523_v26, %v6524_v19  ;;  %2219 = vmatprep.mubr.f32.mxu1 %v6527_v9  ;;  %v6528_v26 = vunpack.i.l.bf16 %v4412_v13  ;;  %v3505_v19 = vunpack.i.h.bf16 %v6530_v1  ;;  %v5311_v58 = vsel %vm960_vm6, %v3340_v42, %v3464_v55 }
 0x246   :  { %6532 = vst [vmem:[#allocation21_spill] sm:$0xff] %v5311_v58  ;;  %v3469_v60 = vunpack.i.l.bf16 %v6533_v5  ;;  %v3047_v42 = vpack.c.bf16 %v4847_v23, %v657_v59  ;;  %v3495_v38 = vunpack.i.h.bf16 %v6510_v62  ;;  %v5342_v23 = vld [vmem:[%s6243_s4 + $0x70] sm:$0xff]  ;;  %v6543_v59 = vunpack.i.h.bf16 %v6513_v61 }
 0x247   :  { %3042 = vmatpush3.bf16.msra.mxu1 %v6525_v47  ;;  %v5302_v56 = vsel %vm908_vm2, %v3454_v51, %v6528_v26  ;;  %v6531_v47 = vunpack.i.l.bf16 %v6514_v31  ;;  %v6534_v51 = vunpack.i.h.bf16 %v6517_v36  ;;  %v6536_v31 = vld [vmem:[#allocation45_spill] sm:$0xff]  ;;  %6542 = vst [vmem:[#allocation46_spill] sm:$0xff] %v5342_v23  ;;  %vm1272_vm8 = vcmask 531456  }
 0x248   :  { %6529 = vst [vmem:[#allocation27_spill] sm:$0xff] %v5302_v56  ;;  %3044 = vmatprep.subr.bf16.mxu1 %v3043_v52  ;;  %v6535_v52 = vld [vmem:[#allocation40_spill] sm:$0xff]  ;;  %v3509_v2 = vunpack.i.l.bf16 %v6536_v31  ;;  %2646 = vmatmul.mubr.msk.f32.gmra.mrb[8].mxu1 %vm856_vm4, %v1621_v57  ;;  %v3510_v36 = vunpack.i.h.bf16 %v6536_v31  ;;  %v6541_v56 = vunpack.i.l.bf16 %v4841_v54  ;;  %v5347_v62 = vsel %vm908_vm2, %v3505_v19, %v6543_v59 }
 0x249   :  { %v5308_v24 = vsel %vm1168_vm5, %v6531_v47, %v3460_v30  ;;  %v5320_v26 = vsel %vm960_vm6, %v3464_v55, %v6534_v51  ;;  %v3475_v29 = vunpack.i.h.bf16 %v6535_v52  ;;  %v5325_v47 = vpop.permute.xlu1 %3667  ;;  %v6538_v55 = vld [vmem:[#allocation52_spill] sm:$0xff]  ;;  %v6539_v51 = vld [vmem:[#allocation5_spill] sm:$0xff]  ;;  %2225 = vmatprep.mubr.f32.mxu1 %v6527_v9  ;;  %v3600_v31 = vunpack.i.h.bf16 %v4976_v7 }
 0x24a   :  { %6537 = vst [vmem:[#allocation23_spill] sm:$0xff] %v5325_v47  ;;  %v6540_v25 = vpack.c.bf16 %v6538_v55, %v6539_v51  ;;  %v709_v30 = vsel %vm700_vm10, %v6541_v56, %v3595_v33  ;;  %v6544_v54 = vunpack.i.h.bf16 %v5315_v27  ;;  %v5359_v55 = vpop.permute.xlu0 %3727  ;;  %vm1064_vm9 = vcmask 687104  }
 0x24b   :  { %v6547_v51 = vunpack.i.l.bf16 %v4403_v8  ;;  %vm1376_vm10 = vcmask 392192  }
 0x24c   :  { %3046 = vmatpush3.bf16.msra.mxu1 %v6540_v25  ;;  %v3599_v25 = vunpack.i.l.bf16 %v4976_v7  ;;  %v5354_v33 = vsel %vm908_vm2, %v3509_v2, %v6544_v54  ;;  %v6545_v2 = vunpack.i.l.bf16 %v4419_v16  ;;  %v3051_v54 = vpack.c.bf16 %v709_v30, %v5265_v20  ;;  %v5387_v20 = vld [vmem:[%s6243_s4 + $0x98] sm:$0xff] }
 0x24d   :  { %3048 = vmatprep.subr.bf16.mxu1 %v3047_v42  ;;  %v3688_v59 = vpop.permute.xlu1 %3687  ;;  %2647 = vmatmul.mubr.msk.f32.gmra.mrb[10].mxu1 %vm856_vm4, %v5342_v23  ;;  %v805_v19 = vsel %vm804_vm13, %v3444_v45, %v6547_v51  ;;  %v3489_v7 = vunpack.i.l.bf16 %v6505_v6  ;;  %6551 = vst [vmem:[#allocation43_spill] sm:$0xff] %v5387_v20  ;;  %v6552_v30 = vunpack.i.h.bf16 %v4412_v13  ;;  %v6553_v45 = vunpack.i.h.bf16 %v4403_v8 }
 0x24e   :  { %v5369_v42 = vsel %vm1012_vm3, %v3469_v60, %v6545_v2  ;;  %v3690_v57 = vunpack.i.h.bf16 %v3688_v59  ;;  %v3689_v63 = vunpack.i.l.bf16 %v3688_v59  ;;  %v6548_v60 = vld [vmem:[#allocation51_spill] sm:$0xff]  ;;  %v6549_v2 = vld [vmem:[#allocation50_spill] sm:$0xff]  ;;  %2231 = vmatprep.mubr.f32.mxu1 %v6527_v9  ;;  %v759_v6 = vsel %vm752_vm11, %v3599_v25, %v3600_v31  ;;  %v5404_v23 = vpop.permute.xlu0 %3732 }
 0x24f   :  { %6546 = vst [vmem:[#allocation38_spill] sm:$0xff] %v5369_v42  ;;  %v6550_v47 = vpack.c.bf16 %v6548_v60, %v6549_v2  ;;  %v5392_v56 = vsel %vm908_vm2, %v6552_v30, %v3510_v36  ;;  %v807_v51 = vsel %vm804_vm13, %v6553_v45, %v3495_v38  ;;  %v6556_v60 = vld [vmem:[#allocation47_spill] sm:$0xff]  ;;  %v6557_v36 = vunpack.i.l.bf16 %v5215_v21 }
 0x250   :  { %v3525_v2 = vunpack.i.h.bf16 %v6556_v60  ;;  %v760_v13 = vsel %vm752_vm11, %v3600_v31, %v3689_v63  ;;  %v6558_v25 = vunpack.i.h.bf16 %v6509_v3  ;;  %v6559_v8 = vunpack.i.h.bf16 %v5215_v21 }
 0x251   :  { %3050 = vmatpush3.bf16.msra.mxu1 %v6550_v47  ;;  %v6554_v47 = vunpack.i.l.bf16 %v6535_v52  ;;  %v5418_v42 = vpop.permute.xlu1 %3692  ;;  %v2943_v31 = vpack.c.bf16 %v4913_v11, %v760_v13  ;;  %v2945_v3 = vpack.c.bf16 %v805_v19, %v759_v6  ;;  %v761_v30 = vsel %vm752_vm11, %v3689_v63, %v3690_v57  ;;  %v5433_v11 = vld [vmem:[%s6243_s4 + $0xc0] sm:$0xff]  ;;  %v6566_v13 = vld [vmem:[#allocation56_spill] sm:$0xff] }
 0x252   :  { %3052 = vmatprep.subr.bf16.mxu1 %v3051_v54  ;;  %v809_v54 = vsel %vm804_vm13, %v6558_v25, %v6557_v36  ;;  %v812_v38 = vsel %vm804_vm13, %v6559_v8, %v3489_v7  ;;  %6562 = vst [vmem:[#allocation41_spill] sm:$0xff] %v5418_v42  ;;  %2648 = vmatmul.mubr.msk.f32.gmra.mrb[12].mxu1 %vm856_vm4, %v5387_v20  ;;  %v3710_v36 = vunpack.i.h.bf16 %v5260_v0  ;;  %v3709_v25 = vunpack.i.l.bf16 %v5260_v0  ;;  %v6564_v8 = vld [vmem:[#allocation11_spill] sm:$0xff]  ;;  %v5449_v58 = vpop.permute.xlu0 %3742 }
 0x253   :  { %v5401_v59 = vsel %vm1220_vm7, %v6554_v47, %v3475_v29  ;;  %v6560_v29 = vld [vmem:[#allocation48_spill] sm:$0xff]  ;;  %v6561_v47 = vld [vmem:[#allocation53_spill] sm:$0xff]  ;;  %2237 = vmatprep.mubr.f32.mxu1 %v6527_v9  ;;  %v3520_v20 = vunpack.i.h.bf16 %v6566_v13  ;;  %v3615_v19 = vunpack.i.h.bf16 %v4867_v12  ;;  %v6357_v6 = vunpack.i.l.bf16 %v4867_v12  ;;  %2944 = vmatprep.subr.bf16.mxu0 %v2943_v31 }
 0x254   :  { %6555 = vst [vmem:[#allocation28_spill] sm:$0xff] %v5401_v59  ;;  %v3500_v45 = vunpack.i.h.bf16 %v6560_v29  ;;  %v3515_v52 = vunpack.i.h.bf16 %v6561_v47  ;;  %v6563_v59 = vld [vmem:[#allocation12_spill] sm:$0xff]  ;;  %v6567_v0 = vpack.c.bf16 %v5225_v50, %v4887_v32  ;;  %v6568_v63 = vunpack.i.h.bf16 %v4419_v16  ;;  %2946 = vmatpush1.bf16.msra.mxu0 %v2945_v3  ;;  %v6570_v3 = vld [vmem:[#allocation54_spill] sm:$0xff] }
 0x255   :  { %v6565_v46 = vpack.c.bf16 %v6563_v59, %v6564_v8  ;;  %v3499_v59 = vunpack.i.l.bf16 %v6560_v29  ;;  %v6358_v8 = vunpack.i.h.bf16 %v4896_v39  ;;  %v3624_v42 = vunpack.i.l.bf16 %v4896_v39  ;;  %v5453_v50 = vpop.permute.xlu1 %3712 }
 0x256   :  { %v5444_v57 = vsel %vm1012_vm3, %v6568_v63, %v3525_v2  ;;  %v6361_v31 = vunpack.i.l.bf16 %v6530_v1  ;;  %v3059_v16 = vpack.c.bf16 %v807_v51, %v761_v30  ;;  %2649 = vmatmul.mubr.msk.f32.gmra.mrb[14].mxu1 %vm856_vm4, %v5433_v11  ;;  %v6569_v2 = vunpack.i.h.bf16 %v6467_v44  ;;  %v5473_v44 = vld [vmem:[%s6243_s4 + $0xe8] sm:$0xff] }
 0x257   :  { %3054 = vmatpush3.bf16.msra.mxu1 %v6565_v46  ;;  %v2947_v46 = vpack.c.bf16 %v812_v38, %v809_v54  ;;  %v6359_v38 = vunpack.i.h.bf16 %v5453_v50  ;;  %v3714_v29 = vunpack.i.l.bf16 %v5453_v50  ;;  %v6573_v32 = vunpack.i.l.bf16 %v5215_v21  ;;  %2243 = vmatprep.mubr.f32.mxu1 %v6527_v9 }
 0x258   :  { %3056 = vmatprep.subr.bf16.mxu1 %v6567_v0  ;;  %v859_v54 = vsel %vm856_vm4, %v6569_v2, %v3500_v45  ;;  %v6571_v0 = vld [vmem:[#allocation55_spill] sm:$0xff]  ;;  %v813_v51 = vsel %vm804_vm13, %v3489_v7, %v3710_v36  ;;  %v6574_v30 = vunpack.i.h.bf16 %v6478_v34  ;;  %v6575_v2 = vunpack.i.h.bf16 %v6533_v5 }
 0x259   :  { %2948 = vmatprep.subr.bf16.mxu0 %v2947_v46  ;;  %v6572_v63 = vpack.c.bf16 %v6570_v3, %v6571_v0  ;;  %v810_v46 = vsel %vm804_vm13, %v6573_v32, %v3709_v25  ;;  %v5489_v7 = vsel %vm1272_vm8, %v6357_v6, %v3615_v19  ;;  %v3724_v36 = vunpack.i.l.bf16 %v5315_v27  ;;  %v6580_v6 = vld [vmem:[#allocation58_spill] sm:$0xff] }
 0x25a   :  { %v5478_v45 = vsel %vm960_vm6, %v6574_v30, %v3515_v52  ;;  %v5483_v21 = vsel %vm1012_vm3, %v3520_v20, %v6575_v2  ;;  %v6576_v34 = vpack.c.bf16 %v5254_v28, %v5247_v4  ;;  %v5495_v52 = vpop.permute.xlu0 %3752  ;;  %v864_v20 = vsel %vm856_vm4, %v3714_v29, %v6359_v38  ;;  %2650 = vmatmul.mubr.msk.f32.gmra.mrb[16].mxu1 %vm856_vm4, %v5473_v44 }
 0x25b   :  { %3058 = vmatpush3.bf16.msra.mxu1 %v6572_v63  ;;  %v5505_v32 = vsel %vm1064_vm9, %v3624_v42, %v6358_v8  ;;  %v6577_v19 = vunpack.i.h.bf16 %v4940_v35  ;;  %v3675_v4 = vunpack.i.h.bf16 %v5036_v40  ;;  %v6362_v3 = vunpack.i.l.bf16 %v5036_v40  ;;  %v3718_v63 = vpop.permute.xlu1 %3717  ;;  %v6581_v8 = vld [vmem:[#allocation57_spill] sm:$0xff]  ;;  %2249 = vmatprep.mubr.f32.mxu1 %v6527_v9 }
 0x25c   :  { %3060 = vmatprep.subr.bf16.mxu1 %v3059_v16  ;;  %2950 = vmatpush1.bf16.msra.mxu0 %v6576_v34  ;;  %v6578_v16 = vunpack.i.l.bf16 %v4940_v35  ;;  %v6360_v0 = vunpack.i.h.bf16 %v5495_v52  ;;  %v6579_v30 = vpack.c.bf16 %v5235_v18, %v5170_v53  ;;  %v3063_v2 = vpack.c.bf16 %v813_v51, %v810_v46  ;;  %v5532_v53 = vld [vmem:[%s6243_s4 + $0x110] sm:$0x3] }
 0x25d   :  { %v3610_v35 = vunpack.i.h.bf16 %v5051_v10  ;;  %v6363_v34 = vunpack.i.l.bf16 %v5051_v10  ;;  %v6582_v25 = vpack.c.bf16 %v6580_v6, %v6581_v8  ;;  %v3619_v18 = vunpack.i.l.bf16 %v5087_v43  ;;  %v6588_v8 = vld [vmem:[#allocation27_spill] sm:$0xff] }
 0x25e   :  { %v5512_v28 = vsel %vm1116_vm0, %v6578_v16, %v6577_v19  ;;  %2952 = vmatprep.subr.bf16.mxu0 %v6579_v30  ;;  %v6364_v19 = vunpack.i.h.bf16 %v5087_v43  ;;  %v3719_v16 = vunpack.i.l.bf16 %v3718_v63  ;;  %v863_v46 = vsel %vm856_vm4, %v3499_v59, %v3714_v29  ;;  %v5549_v38 = vpop.permute.xlu0 %3757  ;;  %v1612_v29 = vld [vmem:[%s6243_s4] sm:$0xff]  ;;  %2651 = vmatmul.mubr.msk.f32.gmra.mrb[18].mxu1 %vm856_vm4, %v5532_v53 }
 0x25f   :  { %3062 = vmatpush3.bf16.msra.mxu1 %v6582_v25  ;;  %v6583_v51 = vunpack.i.l.bf16 %v6556_v60  ;;  %v2955_v6 = vpack.c.bf16 %v5150_v49, %v864_v20  ;;  %vm1324_vm11 = vcmask 523264   ;;  %v6584_v25 = vpack.c.bf16 %v5213_v14, %v5270_v17 }
 0x260   :  { %3064 = vmatprep.subr.bf16.mxu1 %v3063_v2  ;;  %v6585_v59 = vunpack.i.h.bf16 %v6492_v37  ;;  %v6586_v49 = vunpack.i.h.bf16 %v6513_v61  ;;  %v6587_v14 = vunpack.i.h.bf16 %v5315_v27  ;;  %v3630_v2 = vunpack.i.h.bf16 %v5114_v48  ;;  %v6590_v37 = vld [vmem:[#allocation15_spill] sm:$0xff] }
 0x261   :  { %v5541_v30 = vsel %vm1012_vm3, %v6583_v51, %v6360_v0  ;;  %2954 = vmatpush1.bf16.msra.mxu0 %v6584_v25  ;;  %v5569_v51 = vpop.permute.xlu1 %3737  ;;  %v3629_v61 = vunpack.i.l.bf16 %v5114_v48  ;;  %v6589_v0 = vld [vmem:[#allocation16_spill] sm:$0xff] }
 0x262   :  { %v862_v60 = vsel %vm856_vm4, %v6585_v59, %v3719_v16  ;;  %v913_v20 = vsel %vm908_vm2, %v6586_v49, %v3724_v36  ;;  %v916_v17 = vsel %vm908_vm2, %v6587_v14, %v6361_v31  ;;  %v3720_v16 = vunpack.i.h.bf16 %v3718_v63  ;;  %2956 = vmatprep.subr.bf16.mxu0 %v2955_v6  ;;  %v3891_v63 = vld [vmem:[%s6243_s4 + $0x8] sm:$0xff]  ;;  %v1618_v6 = vld [vmem:[%s6243_s4 + $0x30] sm:$0xff] }
 0x263   :  { %v3067_v25 = vpack.c.bf16 %v862_v60, %v859_v54  ;;  %v3730_v59 = vunpack.i.h.bf16 %v5359_v55  ;;  %v6365_v49 = vunpack.i.l.bf16 %v5359_v55  ;;  %v2957_v14 = vpack.c.bf16 %v6588_v8, %v863_v46  ;;  %2320 = vmatprep.mubr.f32.mxu1 %v3891_v63 }
 0x264   :  { %v6591_v31 = vpack.c.bf16 %v6589_v0, %v6590_v37  ;;  %v3734_v54 = vunpack.i.l.bf16 %v5404_v23  ;;  %2000 = vmatmul.mubr.f32.vlgmr.msra.gmra.mrb[6].mxu0 %v1612_v29  ;;  %v2959_v48 = vpack.c.bf16 %v916_v17, %v913_v20  ;;  %v5590_v46 = vsel %vm1272_vm8, %v6363_v34, %v3610_v35  ;;  %v5600_v20 = vpop.permute.xlu0 %3762 }
 0x265   :  { %v3735_v0 = vunpack.i.h.bf16 %v5404_v23  ;;  %v3739_v60 = vunpack.i.l.bf16 %v5569_v51  ;;  %2958 = vmatpush1.bf16.msra.mxu0 %v2957_v14  ;;  %v5605_v17 = vsel %vm1064_vm9, %v3619_v18, %v6364_v19  ;;  %2005 = vmatprep.mubr.f32.mxu0 %v1618_v6  ;;  %v3745_v23 = vunpack.i.h.bf16 %v5449_v58  ;;  %v5617_v14 = vpop.permute.xlu1 %3747 }
 0x266   :  { %3066 = vmatpush3.bf16.msra.mxu1 %v6591_v31  ;;  %v5595_v31 = vsel %vm1376_vm10, %v6362_v3, %v3675_v4  ;;  %v5610_v4 = vsel %vm1064_vm9, %v3630_v2, %v3624_v42  ;;  %v6366_v35 = vunpack.i.l.bf16 %v5449_v58  ;;  %v6592_v37 = vunpack.i.h.bf16 %v5453_v50  ;;  %2960 = vmatprep.subr.bf16.mxu0 %v2959_v48  ;;  %v6593_v3 = vld [vmem:[#allocation32_spill] sm:$0xff]  ;;  %v6594_v42 = vld [vmem:[#allocation59_spill] sm:$0xff]  ;;  %v6597_v48 = vld [vmem:[#allocation17_spill] sm:$0xff] }
 0x267   :  { %3068 = vmatprep.subr.bf16.mxu1 %v3067_v25  ;;  %v5620_v63 = vsel %vm1064_vm9, %v3629_v61, %v3619_v18  ;;  %v3635_v34 = vunpack.i.h.bf16 %v6593_v3  ;;  %v6367_v19 = vunpack.i.l.bf16 %v6593_v3  ;;  %v6595_v2 = vld [vmem:[#allocation60_spill] sm:$0xff]  ;;  %v1177_v50 = vsel %vm1168_vm5, %v6365_v49, %v3730_v59  ;;  %v6605_v49 = vld [vmem:[#allocation13_spill] sm:$0xff] }
 0x268   :  { %v865_v25 = vsel %vm856_vm4, %v6592_v37, %v3720_v16  ;;  %v6596_v8 = vpack.c.bf16 %v6594_v42, %v6595_v2  ;;  %v1617_v16 = vld [vmem:[%s6243_s4 + $0x28] sm:$0xff]  ;;  %v3664_v37 = vunpack.i.l.bf16 %v6597_v48  ;;  %v914_v18 = vsel %vm908_vm2, %v3724_v36, %v3734_v54  ;;  %v5655_v54 = vpop.permute.xlu0 %3772  ;;  %v6609_v42 = vld [vmem:[#allocation21_spill] sm:$0xff] }
 0x269   :  { %v6598_v61 = vpack.c.bf16 %v5308_v24, %v5182_v15  ;;  %2006 = vmatmul.mubr.f32.gmra.mrb[8].mxu0 %v1617_v16  ;;  %v6599_v2 = vunpack.i.l.bf16 %v6530_v1  ;;  %v6368_v36 = vunpack.i.l.bf16 %v5495_v52  ;;  %v3073_v15 = vpack.c.bf16 %v5392_v56, %v865_v25  ;;  %v6606_v1 = vld [vmem:[#allocation19_spill] sm:$0xff] }
 0x26a   :  { %3070 = vmatpush3.bf16.msra.mxu1 %v6596_v8  ;;  %v1623_v8 = vld [vmem:[%s6243_s4 + $0x58] sm:$0xff]  ;;  %v6600_v24 = vpack.c.bf16 %v5354_v33, %v5347_v62  ;;  %v6601_v48 = vunpack.i.h.bf16 %v5569_v51  ;;  %v6602_v56 = vpack.c.bf16 %v5320_v26, %v5195_v41  ;;  %v6603_v62 = vld [vmem:[#allocation37_spill] sm:$0xff]  ;;  %v1229_v25 = vsel %vm1220_vm7, %v6366_v35, %v3745_v23 }
 0x26b   :  { %3072 = vmatprep.subr.bf16.mxu1 %v6598_v61  ;;  %v917_v27 = vsel %vm908_vm2, %v6599_v2, %v3735_v0  ;;  %2011 = vmatprep.mubr.f32.mxu0 %v1623_v8  ;;  %v3749_v0 = vunpack.i.l.bf16 %v5617_v14  ;;  %v5663_v2 = vpop.permute.xlu1 %3767  ;;  %v3075_v33 = vpack.c.bf16 %v6603_v62, %v1177_v50  ;;  %v3660_v59 = vunpack.i.h.bf16 %v6606_v1  ;;  %v1622_v41 = vld [vmem:[%s6243_s4 + $0x50] sm:$0xff]  ;;  %v6608_v62 = vld [vmem:[#allocation34_spill] sm:$0xff] }
 0x26c   :  { %2962 = vmatpush1.bf16.msra.mxu0 %v6600_v24  ;;  %v968_v61 = vsel %vm960_vm6, %v3739_v60, %v6601_v48  ;;  %v6604_v24 = vld [vmem:[#allocation9_spill] sm:$0xff]  ;;  %v5681_v26 = vsel %vm1324_vm11, %v6367_v19, %v3635_v34  ;;  %v3077_v23 = vpack.c.bf16 %v917_v27, %v914_v18  ;;  %v6607_v50 = vunpack.i.l.bf16 %v6561_v47  ;;  %v6610_v34 = vld [vmem:[#allocation39_spill] sm:$0xff]  ;;  %v6612_v18 = vld [vmem:[#allocation28_spill] sm:$0xff] }
 0x26d   :  { %2964 = vmatprep.subr.bf16.mxu0 %v6602_v56  ;;  %2321 = vmatmul.mubr.f32.vlgmr.msra.gmra.mrb[20].mxu1 %v1612_v29  ;;  %v3645_v48 = vunpack.i.h.bf16 %v6604_v24  ;;  %v3760_v35 = vunpack.i.h.bf16 %v5549_v38  ;;  %v6611_v19 = vpack.c.bf16 %v6609_v42, %v6610_v34  ;;  %v5695_v29 = vpop.permute.xlu0 %3782  ;;  %v3079_v47 = vpack.c.bf16 %v1229_v25, %v6612_v18 }
 0x26e   :  { %3074 = vmatpush3.bf16.msra.mxu1 %v3073_v15  ;;  %2325 = vmatprep.mubr.f32.mxu1 %v1618_v6  ;;  %v967_v56 = vsel %vm960_vm6, %v6607_v50, %v3739_v60  ;;  %v2967_v15 = vpack.c.bf16 %v6608_v62, %v968_v61  ;;  %v1628_v6 = vld [vmem:[%s6243_s4 + $0x80] sm:$0xff]  ;;  %v6613_v60 = vunpack.i.h.bf16 %v6533_v5  ;;  %v6614_v61 = vunpack.i.l.bf16 %v6566_v13 }
 0x26f   :  { %3076 = vmatprep.subr.bf16.mxu1 %v3075_v33  ;;  %2012 = vmatmul.mubr.f32.gmra.mrb[10].mxu0 %v1622_v41  ;;  %v6615_v33 = vunpack.i.h.bf16 %v5495_v52  ;;  %v6616_v62 = vld [vmem:[#allocation31_spill] sm:$0xff]  ;;  %v6369_v18 = vunpack.i.h.bf16 %v5695_v29  ;;  %v5714_v5 = vpop.permute.xlu1 %3777  ;;  %v3765_v42 = vunpack.i.h.bf16 %v5600_v20 }
 0x270   :  { %2966 = vmatpush1.bf16.msra.mxu0 %v6611_v19  ;;  %v1017_v27 = vsel %vm1012_vm3, %v6613_v60, %v6368_v36  ;;  %2017 = vmatprep.mubr.f32.mxu0 %v1628_v6  ;;  %v3750_v19 = vunpack.i.h.bf16 %v5617_v14  ;;  %v6617_v34 = vunpack.i.h.bf16 %v6616_v62  ;;  %v6618_v60 = vunpack.i.h.bf16 %v4967_v22  ;;  %v6620_v62 = vld [vmem:[#allocation23_spill] sm:$0xff] }
 0x271   :  { %v1020_v50 = vsel %vm1012_vm3, %v6615_v33, %v6614_v61  ;;  %2968 = vmatprep.subr.bf16.mxu0 %v2967_v15  ;;  %2326 = vmatmul.mubr.f32.gmra.mrb[22].mxu1 %v1617_v16  ;;  %v6619_v61 = vld [vmem:[#allocation38_spill] sm:$0xff]  ;;  %v3764_v14 = vunpack.i.l.bf16 %v5600_v20  ;;  %v3769_v16 = vunpack.i.l.bf16 %v5663_v2  ;;  %v3670_v20 = vunpack.i.h.bf16 %v6620_v62 }
 0x272   :  { %v966_v25 = vsel %vm960_vm6, %v6617_v34, %v3749_v0  ;;  %v5719_v36 = vsel %vm1116_vm0, %v3660_v59, %v6618_v60  ;;  %v2969_v33 = vpack.c.bf16 %v6619_v61, %v967_v56  ;;  %3078 = vmatpush3.bf16.msra.mxu1 %v3077_v23  ;;  %2330 = vmatprep.mubr.f32.mxu1 %v1623_v8  ;;  %v1627_v0 = vld [vmem:[%s6243_s4 + $0x78] sm:$0xff]  ;;  %v3669_v8 = vunpack.i.l.bf16 %v6620_v62  ;;  %v5739_v60 = vpop.permute.xlu0 %3787  ;;  %v6621_v61 = vld [vmem:[#allocation36_spill] sm:$0xff] }
 0x273   :  { %v5732_v59 = vsel %vm1116_vm0, %v3664_v37, %v6369_v18  ;;  %3080 = vmatprep.subr.bf16.mxu1 %v3079_v47  ;;  %v2971_v56 = vpack.c.bf16 %v1020_v50, %v1017_v27  ;;  %2018 = vmatmul.mubr.f32.gmra.mrb[12].mxu0 %v1627_v0  ;;  %v3081_v23 = vpack.c.bf16 %v966_v25, %v5478_v45  ;;  %v3700_v15 = vunpack.i.h.bf16 %v6621_v61  ;;  %v5746_v50 = vpop.permute.xlu1 %3792 }
 0x274   :  { %2970 = vmatpush1.bf16.msra.mxu0 %v2969_v33  ;;  %v3644_v37 = vunpack.i.l.bf16 %v6604_v24  ;;  %v6622_v47 = vunpack.i.h.bf16 %v5569_v51  ;;  %v6623_v45 = vunpack.i.l.bf16 %v5549_v38  ;;  %v6624_v33 = vunpack.i.l.bf16 %v5495_v52 }
 0x275   :  { %2972 = vmatprep.subr.bf16.mxu0 %v2971_v56  ;;  %2331 = vmatmul.mubr.f32.gmra.mrb[24].mxu1 %v1622_v41  ;;  %v6625_v18 = vunpack.i.l.bf16 %v6566_v13  ;;  %v3775_v51 = vunpack.i.h.bf16 %v5655_v54  ;;  %v1633_v41 = vld [vmem:[%s6243_s4 + $0xa8] sm:$0xff]  ;;  %v3779_v13 = vunpack.i.l.bf16 %v5714_v5  ;;  %v3659_v56 = vunpack.i.l.bf16 %v6606_v1 }
 0x276   :  { %v969_v27 = vsel %vm960_vm6, %v6622_v47, %v3750_v19  ;;  %v1281_v25 = vsel %vm1272_vm8, %v6623_v45, %v3760_v35  ;;  %v1018_v34 = vsel %vm1012_vm3, %v6624_v33, %v3764_v14  ;;  %v3774_v19 = vunpack.i.l.bf16 %v5655_v54  ;;  %3082 = vmatpush3.bf16.msra.mxu1 %v3081_v23  ;;  %2335 = vmatprep.mubr.f32.mxu1 %v1628_v6  ;;  %v5780_v23 = vpop.permute.xlu0 %3802  ;;  %v6632_v33 = vld [vmem:[#allocation41_spill] sm:$0xff]  ;;  %v6665_v54 = vld [vmem:[#allocation22_spill] sm:$0xff] }
 0x277   :  { %v1021_v24 = vsel %vm1012_vm3, %v6625_v18, %v3765_v42  ;;  %v6626_v35 = vunpack.i.h.bf16 %v5087_v43  ;;  %v3784_v14 = vunpack.i.l.bf16 %v5695_v29  ;;  %v6627_v42 = vpack.c.bf16 %v5489_v7, %v5590_v46  ;;  %2023 = vmatprep.mubr.f32.mxu0 %v1633_v41 }
 0x278   :  { %v6628_v18 = vunpack.i.h.bf16 %v5663_v2  ;;  %v3085_v43 = vpack.c.bf16 %v5444_v57, %v969_v27  ;;  %v6630_v47 = vunpack.i.h.bf16 %v6605_v49  ;;  %v6631_v7 = vunpack.i.l.bf16 %v6605_v49 }
 0x279   :  { %v5765_v52 = vsel %vm1064_vm9, %v6626_v35, %v3645_v48  ;;  %3084 = vmatprep.subr.bf16.mxu1 %v6627_v42  ;;  %v6629_v48 = vpack.c.bf16 %v5541_v30, %v5483_v21  ;;  %v5790_v45 = vsel %vm1376_vm10, %v3669_v8, %v3670_v20  ;;  %v3695_v35 = vunpack.i.h.bf16 %v6632_v33  ;;  %v5794_v21 = vpop.permute.xlu1 %3797  ;;  %2336 = vmatmul.mubr.f32.gmra.mrb[26].mxu1 %v1627_v0 }
 0x27a   :  { %v1072_v6 = vsel %vm1064_vm9, %v3769_v16, %v6628_v18  ;;  %v1330_v46 = vsel %vm1324_vm11, %v6631_v7, %v6630_v47  ;;  %v3694_v57 = vunpack.i.l.bf16 %v6632_v33  ;;  %v3089_v27 = vpack.c.bf16 %v1021_v24, %v1018_v34  ;;  %3086 = vmatpush3.bf16.msra.mxu1 %v3085_v43  ;;  %2340 = vmatprep.mubr.f32.mxu1 %v1633_v41  ;;  %v1632_v34 = vld [vmem:[%s6243_s4 + $0xa0] sm:$0xff]  ;;  %v5833_v41 = vpop.permute.xlu0 %3812  ;;  %v6638_v7 = vld [vmem:[#allocation30_spill] sm:$0xff] }
 0x27b   :  { %2974 = vmatpush1.bf16.msra.mxu0 %v6629_v48  ;;  %v6633_v30 = vpack.c.bf16 %v5505_v32, %v5605_v17  ;;  %v3087_v42 = vpack.c.bf16 %v5681_v26, %v1281_v25  ;;  %v3699_v18 = vunpack.i.l.bf16 %v6621_v61  ;;  %v1071_v48 = vsel %vm1064_vm9, %v3644_v37, %v3769_v16  ;;  %v1638_v16 = vld [vmem:[%s6243_s4 + $0xd0] sm:$0xff] }
 0x27c   :  { %v2979_v20 = vpack.c.bf16 %v5512_v28, %v1072_v6  ;;  %v1333_v32 = vsel %vm1324_vm11, %v3774_v19, %v3775_v51  ;;  %v3780_v17 = vunpack.i.h.bf16 %v5714_v5  ;;  %v6634_v26 = vunpack.i.h.bf16 %v4896_v39  ;;  %2024 = vmatmul.mubr.f32.gmra.mrb[14].mxu0 %v1632_v34 }
 0x27d   :  { %2976 = vmatprep.subr.bf16.mxu0 %v6633_v30  ;;  %3088 = vmatprep.subr.bf16.mxu1 %v3087_v42  ;;  %v6635_v28 = vunpack.i.h.bf16 %v4967_v22  ;;  %v6636_v37 = vunpack.i.h.bf16 %v5695_v29  ;;  %v3790_v39 = vunpack.i.h.bf16 %v5739_v60  ;;  %v3789_v25 = vunpack.i.l.bf16 %v5739_v60  ;;  %v3808_v43 = vpop.permute.xlu1 %3807  ;;  %v6641_v42 = vld [vmem:[#allocation29_spill] sm:$0xff] }
 0x27e   :  { %v1070_v0 = vsel %vm1064_vm9, %v6634_v26, %v3779_v13  ;;  %v3795_v24 = vunpack.i.h.bf16 %v5746_v50  ;;  %v3794_v51 = vunpack.i.l.bf16 %v5746_v50  ;;  %v6637_v22 = vpack.c.bf16 %v5610_v4, %v5620_v63  ;;  %2029 = vmatprep.mubr.f32.mxu0 %v1638_v16  ;;  %2341 = vmatmul.mubr.f32.gmra.mrb[28].mxu1 %v1632_v34  ;;  %v1637_v4 = vld [vmem:[%s6243_s4 + $0xc8] sm:$0xff]  ;;  %v6639_v63 = vld [vmem:[#allocation10_spill] sm:$0xff] }
 0x27f   :  { %v1121_v61 = vsel %vm1116_vm0, %v6635_v28, %v3784_v14  ;;  %v1124_v5 = vsel %vm1116_vm0, %v6636_v37, %v3659_v56  ;;  %v5836_v13 = vsel %vm1168_vm5, %v3700_v15, %v3695_v35  ;;  %v5839_v6 = vsel %vm1168_vm5, %v3699_v18, %v3694_v57  ;;  %3090 = vmatpush3.bf16.msra.mxu1 %v3089_v27 }
 0x280   :  { %2978 = vmatpush1.bf16.msra.mxu0 %v6637_v22  ;;  %v3091_v47 = vpack.c.bf16 %v1333_v32, %v1330_v46  ;;  %v2981_v33 = vpack.c.bf16 %v6638_v7, %v1071_v48  ;;  %2345 = vmatprep.mubr.f32.mxu1 %v1638_v16  ;;  %v6640_v30 = vunpack.i.l.bf16 %v6639_v63  ;;  %v6642_v26 = vunpack.i.l.bf16 %v6641_v42  ;;  %v1643_v32 = vld [vmem:[%s6243_s4 + $0xf8] sm:$0x3] }
 0x281   :  { %2980 = vmatprep.subr.bf16.mxu0 %v2979_v20  ;;  %v6643_v20 = vunpack.i.h.bf16 %v5663_v2  ;;  %v3093_v48 = vpack.c.bf16 %v1070_v0, %v5765_v52  ;;  %v3804_v27 = vunpack.i.l.bf16 %v5780_v23  ;;  %v2983_v34 = vpack.c.bf16 %v1124_v5, %v1121_v61  ;;  %2030 = vmatmul.mubr.f32.gmra.mrb[16].mxu0 %v1637_v4  ;;  %v3818_v0 = vpop.permute.xlu1 %3817 }
 0x282   :  { %v1170_v15 = vsel %vm1168_vm5, %v3694_v57, %v6640_v30  ;;  %v1173_v18 = vsel %vm1168_vm5, %v3695_v35, %v6642_v26  ;;  %3092 = vmatprep.subr.bf16.mxu1 %v3091_v47  ;;  %v3799_v57 = vunpack.i.l.bf16 %v5794_v21  ;;  %v3809_v16 = vunpack.i.l.bf16 %v3808_v43  ;;  %v5860_v35 = vpop.permute.xlu0 %3822  ;;  %2035 = vmatprep.mubr.f32.mxu0 %v1643_v32 }
 0x283   :  { %v1073_v46 = vsel %vm1064_vm9, %v6643_v20, %v3780_v17  ;;  %v1385_v2 = vsel %vm1376_vm10, %v3794_v51, %v3795_v24  ;;  %v1431_v52 = vsel %vm1428_vm15, %v3789_v25, %v3790_v39  ;;  %v3800_v17 = vunpack.i.h.bf16 %v5794_v21  ;;  %2346 = vmatmul.mubr.f32.gmra.mrb[30].mxu1 %v1637_v4  ;;  %v1642_v39 = vld [vmem:[%s6243_s4 + $0xf0] sm:$0x3]  ;;  %v6644_v24 = vld [vmem:[#allocation20_spill] sm:$0xff] }
 0x284   :  { %2982 = vmatpush1.bf16.msra.mxu0 %v2981_v33  ;;  %v3095_v28 = vpack.c.bf16 %v5595_v31, %v5790_v45  ;;  %v2989_v61 = vpack.c.bf16 %v5836_v13, %v5839_v6  ;;  %v3810_v37 = vunpack.i.h.bf16 %v3808_v43  ;;  %3094 = vmatpush3.bf16.msra.mxu1 %v3093_v48  ;;  %v2987_v5 = vpack.c.bf16 %v1173_v18, %v1170_v15  ;;  %v1615_v45 = vld [vmem:[%s6243_s4 + $0x18] sm:$0xff] }
 0x285   :  { %2984 = vmatprep.subr.bf16.mxu0 %v2983_v34  ;;  %2350 = vmatprep.mubr.f32.mxu1 %v1643_v32  ;;  %v3097_v22 = vpack.c.bf16 %v6644_v24, %v1073_v46  ;;  %v3805_v21 = vunpack.i.h.bf16 %v5780_v23  ;;  %v3099_v47 = vpack.c.bf16 %v1431_v52, %v1385_v2  ;;  %v6645_v7 = vunpack.i.l.bf16 %v5359_v55  ;;  %v6647_v33 = vld [vmem:[#allocation14_spill] sm:$0xff]  ;;  %v3828_v42 = vpop.permute.xlu1 %3827  ;;  %v6649_v46 = vld [vmem:[#allocation40_spill] sm:$0xff]  ;;  %v5922_v24 = vld [vmem:[%s6243_s4 + $0x10] sm:$0xff] }
 0x286   :  { %3096 = vmatprep.subr.bf16.mxu1 %v3095_v28  ;;  %2036 = vmatmul.mubr.f32.gmra.mrb[18].mxu0 %v1642_v39  ;;  %v1122_v13 = vsel %vm1116_vm0, %v3784_v14, %v3799_v57  ;;  %v3815_v6 = vunpack.i.h.bf16 %v5833_v41  ;;  %v3814_v43 = vunpack.i.l.bf16 %v5833_v41  ;;  %v6646_v23 = vpack.c.bf16 %v5732_v59, %v5719_v36  ;;  %v3833_v55 = vpop.permute.xlu0 %3832 }
 0x287   :  { %v1176_v31 = vsel %vm1168_vm5, %v3804_v27, %v6645_v7  ;;  %v6648_v4 = vunpack.i.l.bf16 %v6647_v33  ;;  %2106 = vmatprep.mubr.f32.mxu0 %v1615_v45  ;;  %v1125_v29 = vsel %vm1116_vm0, %v3659_v56, %v3800_v17  ;;  %v3824_v14 = vunpack.i.l.bf16 %v5860_v35  ;;  %2351 = vmatmul.mubr.f32.gmra.mrb[32].mxu1 %v1642_v39  ;;  %v6654_v17 = vld [vmem:[#allocation18_spill] sm:$0xff] }
 0x288   :  { %2986 = vmatpush1.bf16.msra.mxu0 %v6646_v23  ;;  %v3835_v30 = vunpack.i.h.bf16 %v3833_v55  ;;  %v3834_v15 = vunpack.i.l.bf16 %v3833_v55  ;;  %v1221_v36 = vsel %vm1220_vm7, %v3810_v37, %v3809_v16  ;;  %v3825_v59 = vunpack.i.h.bf16 %v5860_v35  ;;  %3098 = vmatpush3.bf16.msra.mxu1 %v3097_v22  ;;  %v6652_v35 = vld [vmem:[#allocation24_spill] sm:$0xff] }
 0x289   :  { %v1222_v63 = vsel %vm1220_vm7, %v3809_v16, %v6648_v4  ;;  %2988 = vmatprep.subr.bf16.mxu0 %v2987_v5  ;;  %v3820_v41 = vunpack.i.h.bf16 %v3818_v0  ;;  %v3819_v26 = vunpack.i.l.bf16 %v3818_v0  ;;  %2420 = vmatprep.mubr.f32.mxu1 %v1615_v45  ;;  %v1175_v1 = vsel %vm1168_vm5, %v3805_v21, %v3804_v27  ;;  %v3838_v28 = vpop.permute.xlu1 %3837 }
 0x28a   :  { %3100 = vmatprep.subr.bf16.mxu1 %v3099_v47  ;;  %v2991_v18 = vpack.c.bf16 %v1222_v63, %v1176_v31  ;;  %v3101_v56 = vpack.c.bf16 %v1125_v29, %v1122_v13  ;;  %v3843_v20 = vpop.permute.xlu0 %3842  ;;  %v6650_v48 = vunpack.i.l.bf16 %v6649_v46  ;;  %v6651_v32 = vunpack.i.l.bf16 %v5449_v58  ;;  %v5931_v13 = vld [vmem:[%s6243_s4 + $0x40] sm:$0xff] }
 0x28b   :  { %v2993_v16 = vpack.c.bf16 %v1221_v36, %v1175_v1  ;;  %v6653_v2 = vunpack.i.h.bf16 %v6652_v35  ;;  %v6655_v0 = vunpack.i.h.bf16 %v6654_v17  ;;  %v1227_v5 = vsel %vm1220_vm7, %v3820_v41, %v3815_v6  ;;  %v5946_v36 = vld [vmem:[%s6243_s4 + $0x68] sm:$0xff] }
 0x28c   :  { %2990 = vmatpush1.bf16.msra.mxu0 %v2989_v61  ;;  %v1225_v34 = vsel %vm1220_vm7, %v3814_v43, %v6650_v48  ;;  %v1228_v57 = vsel %vm1220_vm7, %v3815_v6, %v6651_v32  ;;  %v6656_v61 = vunpack.i.l.bf16 %v5051_v10  ;;  %v1224_v58 = vsel %vm1220_vm7, %v3819_v26, %v3814_v43  ;;  %3102 = vmatpush3.bf16.msra.mxu1 %v3101_v56  ;;  %v6662_v48 = vld [vmem:[#allocation6_spill] sm:$0xff] }
 0x28d   :  { %v1434_v52 = vsel %vm1428_vm15, %v6653_v2, %v3834_v15  ;;  %v1437_v27 = vsel %vm1428_vm15, %v6655_v0, %v3835_v30  ;;  %2992 = vmatprep.subr.bf16.mxu0 %v2991_v18  ;;  %v3830_v39 = vunpack.i.h.bf16 %v3828_v42  ;;  %v6657_v22 = vunpack.i.l.bf16 %v4867_v12  ;;  %v3848_v55 = vpop.permute.xlu1 %3847  ;;  %v5939_v30 = vld [vmem:[%s6243_s4 + $0x38] sm:$0xff]  ;;  %v5966_v2 = vld [vmem:[%s6243_s4 + $0x60] sm:$0xff] }
 0x28e   :  { %v1274_v37 = vsel %vm1272_vm8, %v3824_v14, %v6656_v61  ;;  %v3829_v47 = vunpack.i.l.bf16 %v3828_v42  ;;  %v3844_v7 = vunpack.i.l.bf16 %v3843_v20  ;;  %v3839_v10 = vunpack.i.l.bf16 %v3838_v28  ;;  %v3853_v43 = vpop.permute.xlu0 %3852 }
 0x28f   :  { %v1277_v21 = vsel %vm1272_vm8, %v3825_v59, %v6657_v22  ;;  %v2995_v31 = vpack.c.bf16 %v1228_v57, %v1225_v34  ;;  %v3921_v45 = vmov 0.0|0.0   ;;  %v3104_v6 = vpack.c.bf16 %v1437_v27, %v1434_v52  ;;  %2421 = vmatmul.mubr.f32.vlgmr.msra.gmra.mrb[34].mxu1 %v5922_v24 }
 0x290   :  { %3103 = vmatprep.subr.bf16.mxu1 %v3921_v45  ;;  %2994 = vmatpush1.bf16.msra.mxu0 %v2993_v16  ;;  %v2997_v23 = vpack.c.bf16 %v1227_v5, %v1224_v58  ;;  %v2999_v12 = vpack.c.bf16 %v1277_v21, %v1274_v37  ;;  %v1276_v33 = vsel %vm1272_vm8, %v3830_v39, %v3825_v59  ;;  %v3845_v4 = vunpack.i.h.bf16 %v3843_v20  ;;  %v6660_v20 = vld [vmem:[#allocation25_spill] sm:$0xff] }
 0x291   :  { %2996 = vmatprep.subr.bf16.mxu0 %v2995_v31  ;;  %v3850_v63 = vunpack.i.h.bf16 %v3848_v55  ;;  %v3849_v29 = vunpack.i.l.bf16 %v3848_v55  ;;  %3105 = vmatpush3.bf16.msra.mxu1 %v3104_v6  ;;  %v1273_v15 = vsel %vm1272_vm8, %v3829_v47, %v3824_v14  ;;  %v3840_v42 = vunpack.i.h.bf16 %v3838_v28  ;;  %v5972_v28 = vld [vmem:[%s6243_s4 + $0x90] sm:$0xff] }
 0x292   :  { %2425 = vmatprep.mubr.f32.mxu1 %v5931_v13  ;;  %3106 = vmatprep.subr.bf16.mxu1 %v3921_v45  ;;  %v6658_v59 = vunpack.i.l.bf16 %v5549_v38  ;;  %v6659_v26 = vunpack.i.l.bf16 %v6593_v3  ;;  %v3855_v1 = vunpack.i.h.bf16 %v3853_v43  ;;  %v3854_v56 = vunpack.i.l.bf16 %v3853_v43  ;;  %v1479_v57 = vpop.permute.xlu0 %1478  ;;  %v3858_v38 = vpop.permute.xlu1 %3857 }
 0x293   :  { %v6661_v14 = vunpack.i.h.bf16 %v6660_v20  ;;  %v6663_v34 = vunpack.i.h.bf16 %v6662_v48  ;;  %2426 = vmatmul.mubr.f32.gmra.mrb[36].mxu1 %v5939_v30  ;;  %v3001_v3 = vpack.c.bf16 %v1276_v33, %v1273_v15  ;;  %v1325_v35 = vsel %vm1324_vm11, %v3845_v4, %v3844_v7 }
 0x294   :  { %v1280_v41 = vsel %vm1272_vm8, %v3839_v10, %v6658_v59  ;;  %v1326_v18 = vsel %vm1324_vm11, %v3844_v7, %v6659_v26  ;;  %2998 = vmatpush1.bf16.msra.mxu0 %v2997_v23  ;;  %2430 = vmatprep.mubr.f32.mxu1 %v5946_v36  ;;  %v1279_v52 = vsel %vm1272_vm8, %v3840_v42, %v3839_v10  ;;  %v3860_v17 = vunpack.i.h.bf16 %v3858_v38  ;;  %v5996_v23 = vld [vmem:[%s6243_s4 + $0xb8] sm:$0xff] }
 0x295   :  { %v1486_v46 = vsel %vm1480_vm12, %v6661_v14, %v3850_v63  ;;  %v1483_v32 = vsel %vm1480_vm12, %v6663_v34, %v3849_v29  ;;  %3000 = vmatprep.subr.bf16.mxu0 %v2999_v12  ;;  %v3859_v0 = vunpack.i.l.bf16 %v3858_v38  ;;  %v3003_v27 = vpack.c.bf16 %v1326_v18, %v1280_v41  ;;  %v6667_v12 = vld [vmem:[#allocation7_spill] sm:$0xff]  ;;  %v6670_v18 = vld [vmem:[#allocation42_spill] sm:$0xff] }
 0x296   :  { %v3107_v16 = vpack.c.bf16 %v1486_v46, %v1483_v32  ;;  %v3868_v61 = vpop.permute.xlu0 %3867  ;;  %v6664_v37 = vunpack.i.l.bf16 %v6605_v49  ;;  %v1332_v58 = vsel %vm1324_vm11, %v3855_v1, %v3774_v19  ;;  %v3863_v21 = vpop.permute.xlu1 %3862  ;;  %v3005_v47 = vpack.c.bf16 %v1325_v35, %v1279_v52  ;;  %v5986_v49 = vld [vmem:[%s6243_s4 + $0x88] sm:$0xff]  ;;  %v6672_v46 = vld [vmem:[#allocation35_spill] sm:$0xff] }
 0x297   :  { %v3870_v39 = vunpack.i.h.bf16 %v3868_v61  ;;  %v3869_v22 = vunpack.i.l.bf16 %v3868_v61  ;;  %2431 = vmatmul.mubr.f32.gmra.mrb[38].mxu1 %v5966_v2  ;;  %v3864_v7 = vunpack.i.l.bf16 %v3863_v21  ;;  %v6666_v10 = vunpack.i.h.bf16 %v6665_v54  ;;  %v1639_v61 = vld [vmem:[%s6243_s4 + $0xd8] sm:$0xff] }
 0x298   :  { %3108 = vmatpush3.bf16.msra.mxu1 %v3107_v16  ;;  %3002 = vmatpush1.bf16.msra.mxu0 %v3001_v3  ;;  %v1329_v5 = vsel %vm1324_vm11, %v3854_v56, %v6664_v37  ;;  %v1331_v31 = vsel %vm1324_vm11, %v3860_v17, %v3855_v1  ;;  %v1328_v6 = vsel %vm1324_vm11, %v3859_v0, %v3854_v56  ;;  %v3865_v55 = vunpack.i.h.bf16 %v3863_v21 }
 0x299   :  { %3109 = vmatprep.subr.bf16.mxu1 %v3921_v45  ;;  %3004 = vmatprep.subr.bf16.mxu0 %v3003_v27  ;;  %v1489_v19 = vsel %vm1480_vm12, %v6666_v10, %v1479_v57  ;;  %v3007_v43 = vpack.c.bf16 %v1332_v58, %v1329_v5  ;;  %v6668_v33 = vunpack.i.h.bf16 %v6667_v12  ;;  %v1378_v29 = vsel %vm1376_vm10, %v3869_v22, %v3669_v8  ;;  %v6020_v8 = vld [vmem:[%s6243_s4 + $0xe0] sm:$0xff]  ;;  %v1645_v58 = vld [vmem:[%s6243_s4 + $0x108] sm:$0x3]  ;;  %v6674_v10 = vld [vmem:[#allocation26_spill] sm:$0xff] }
 0x29a   :  { %2435 = vmatprep.mubr.f32.mxu1 %v5972_v28  ;;  %v1531_v63 = vpop.permute.xlu0 %1530  ;;  %v6669_v15 = vunpack.i.l.bf16 %v5036_v40  ;;  %v3873_v41 = vpop.permute.xlu1 %3872  ;;  %v3009_v26 = vpack.c.bf16 %v1331_v31, %v1328_v6  ;;  %v6671_v1 = vunpack.i.l.bf16 %v6670_v18  ;;  %v6015_v40 = vld [vmem:[%s6243_s4 + $0xb0] sm:$0xff]  ;;  %v6673_v48 = vunpack.i.l.bf16 %v6672_v46  ;;  %v6676_v31 = vld [vmem:[#allocation8_spill] sm:$0xff] }
 0x29b   :  { %v1535_v4 = vsel %vm1532_vm14, %v6668_v33, %v3864_v7  ;;  %2436 = vmatmul.mubr.f32.gmra.mrb[40].mxu1 %v5986_v49  ;;  %v3875_v20 = vunpack.i.h.bf16 %v3873_v41  ;;  %v3874_v14 = vunpack.i.l.bf16 %v3873_v41  ;;  %vm3922_vm12 = vmmov 0   ;;  %v3892_v33 = vld [vmem:[%s6243_s4 + $0x20] sm:$0xff] }
 0x29c   :  { %3006 = vmatpush1.bf16.msra.mxu0 %v3005_v47  ;;  %v1381_v42 = vsel %vm1376_vm10, %v3870_v39, %v6669_v15  ;;  %v3110_v59 = vpack.c.bf16 %v1535_v4, %v1489_v19  ;;  %v1541_v56 = vsel %vm1532_vm14, %v6671_v1, %v1531_v63  ;;  %2440 = vmatprep.mubr.f32.mxu1 %v5996_v23  ;;  %v6675_v19 = vunpack.i.h.bf16 %v6674_v10 }
 0x29d   :  { %3008 = vmatprep.subr.bf16.mxu0 %v3007_v43  ;;  %v3011_v62 = vpack.c.bf16 %v1381_v42, %v1378_v29  ;;  %v1538_v34 = vsel %vm1532_vm14, %v6673_v48, %v3865_v55  ;;  %v1380_v32 = vsel %vm1376_vm10, %v3875_v20, %v3870_v39  ;;  %v1377_v57 = vsel %vm1376_vm10, %v3874_v14, %v3869_v22  ;;  %v6678_v55 = vld [vmem:[#allocation44_spill] sm:$0xff] }
 0x29e   :  { %3111 = vmatpush3.bf16.msra.mxu1 %v3110_v59  ;;  %v3883_v16 = vpop.permute.xlu0 %3882  ;;  %v3113_v38 = vpack.c.bf16 %v1541_v56, %v1538_v34  ;;  %v3013_v3 = vpack.c.bf16 %v1380_v32, %v1377_v57  ;;  %v3878_v17 = vpop.permute.xlu1 %3877 }
 0x29f   :  { %3112 = vmatprep.subr.bf16.mxu1 %v3921_v45  ;;  %v3885_v35 = vunpack.i.h.bf16 %v3883_v16  ;;  %v3884_v52 = vunpack.i.l.bf16 %v3883_v16  ;;  %2441 = vmatmul.mubr.f32.gmra.mrb[42].mxu1 %v6015_v40  ;;  %v3880_v0 = vunpack.i.h.bf16 %v3878_v17  ;;  %v3879_v27 = vunpack.i.l.bf16 %v3878_v17 }
 0x2a0   :  { %3010 = vmatpush1.bf16.msra.mxu0 %v3009_v26  ;;  %2445 = vmatprep.mubr.f32.mxu1 %v6020_v8 }
 0x2a1   :  { %3012 = vmatprep.subr.bf16.mxu0 %v3011_v62  ;;  %v1429_v37 = vsel %vm1428_vm15, %v3885_v35, %v3884_v52  ;;  %v1430_v5 = vsel %vm1428_vm15, %v3884_v52, %v3789_v25  ;;  %v1383_v39 = vsel %vm1376_vm10, %v3880_v0, %v3879_v27  ;;  %v1384_v22 = vsel %vm1376_vm10, %v3879_v27, %v3794_v51  ;;  %v1644_v25 = vld [vmem:[%s6243_s4 + $0x100] sm:$0x3] }
 0x2a2   :  { %3114 = vmatpush3.bf16.msra.mxu1 %v3113_v38  ;;  %v3017_v21 = vpack.c.bf16 %v1429_v37, %v1383_v39  ;;  %v3888_v47 = vpop.permute.xlu1 %3887  ;;  %v3015_v7 = vpack.c.bf16 %v1430_v5, %v1384_v22  ;;  %v6677_v51 = vunpack.i.h.bf16 %v6676_v31  ;;  %v1583_v43 = vpop.permute.xlu0 %1582 }
 0x2a3   :  { %3115 = vmatprep.subr.bf16.mxu1 %v3921_v45  ;;  %2446 = vmatmul.mubr.f32.gmra.mrb[44].mxu1 %v1639_v61  ;;  %v3890_v60 = vunpack.i.h.bf16 %v3888_v47  ;;  %v3889_v54 = vunpack.i.l.bf16 %v3888_v47  ;;  %v1593_v12 = vsel %vm1584_vm1, %v6678_v55, %v1583_v43 }
 0x2a4   :  { %3014 = vmatpush1.bf16.msra.mxu0 %v3013_v3  ;;  %2450 = vmatprep.mubr.f32.mxu1 %v1645_v58 }
 0x2a5   :  { %3016 = vmatprep.subr.bf16.mxu0 %v3015_v7  ;;  %v1590_v50 = vsel %vm1584_vm1, %v6675_v19, %v3890_v60  ;;  %v1587_v45 = vsel %vm1584_vm1, %v6677_v51, %v3889_v54 }
 0x2a6   :  { %v3116_v6 = vpack.c.bf16 %v1590_v50, %v1587_v45  ;;  %v1882_v0 = vpop.permute.xlu1 %1881  ;;  %v1887_v39 = vpop.permute.xlu0 %1886 }
 0x2a7   :  { %2451 = vmatmul.mubr.f32.gmra.mrb[46].mxu1 %v1644_v25 }
 0x2a8   :  { %3018 = vmatpush1.bf16.msra.mxu0 %v3017_v21  ;;  %2826 = vmatprep.mubr.msk.f32.mxu1 %vm3922_vm12, %v6527_v9 }
 0x2a9   :  { %3117 = vmatpush3.bf16.msra.mxu1 %v3116_v6 }
 0x2aa   :  { %2824 = vmatprep.subr.mxu1 %v6527_v9  ;;  %v1892_v54 = vpop.permute.xlu1 %1891  ;;  %v6129_v51 = vpop.permute.xlu0 %1896 }
 0x2ab   :  { %2107 = vmatmul.mubr.f32.vlgmr.msra.gmra.mrb[6].mxu0 %v5922_v24  ;;  %v3893_v24 = vld [vmem:[%s6243_s4 + $0x48] sm:$0xff] }
 0x2ac   :  { %2112 = vmatprep.mubr.f32.mxu0 %v5931_v13  ;;  %v6679_v13 = vld [vmem:[#allocation46_spill] sm:$0xff] }
 0x2ad   :  { %2825 = vmatpush3.msra.mxu1 %v1593_v12 }
 0x2ae   :  { %2827 = vmatmul.mubr.msk.f32.vlgmr.msra.gmra.mrb[48].mxu1 %vm856_vm4, %v3892_v33  ;;  %v6134_v33 = vpop.permute.xlu1 %1901 }
 0x2af   :  { %2113 = vmatmul.mubr.f32.gmra.mrb[8].mxu0 %v5939_v30  ;;  %2829 = vmatprep.mubr.msk.f32.mxu1 %vm3922_vm12, %v6527_v9  ;;  %v6680_v30 = vld [vmem:[#allocation43_spill] sm:$0xff] }
 0x2b0   :  { %2118 = vmatprep.mubr.f32.mxu0 %v5946_v36 }
 0x2b2   :  { %2830 = vmatmul.mubr.msk.f32.gmra.mrb[50].mxu1 %vm856_vm4, %v3893_v24 }
 0x2b3   :  { %2119 = vmatmul.mubr.f32.gmra.mrb[10].mxu0 %v5966_v2  ;;  %2832 = vmatprep.mubr.msk.f32.mxu1 %vm3922_vm12, %v6527_v9 }
 0x2b4   :  { %2124 = vmatprep.mubr.f32.mxu0 %v5972_v28 }
 0x2b6   :  { %2833 = vmatmul.mubr.msk.f32.gmra.mrb[52].mxu1 %vm856_vm4, %v6679_v13 }
 0x2b7   :  { %2125 = vmatmul.mubr.f32.gmra.mrb[12].mxu0 %v5986_v49  ;;  %2835 = vmatprep.mubr.msk.f32.mxu1 %vm3922_vm12, %v6527_v9 }
 0x2b8   :  { %2130 = vmatprep.mubr.f32.mxu0 %v5996_v23 }
 0x2ba   :  { %2836 = vmatmul.mubr.msk.f32.gmra.mrb[54].mxu1 %vm856_vm4, %v6680_v30 }
 0x2bb   :  { %2131 = vmatmul.mubr.f32.gmra.mrb[14].mxu0 %v6015_v40  ;;  %2838 = vmatprep.mubr.msk.f32.mxu1 %vm3922_vm12, %v6527_v9 }
 0x2bc   :  { %2136 = vmatprep.mubr.f32.mxu0 %v6020_v8 }
 0x2be   :  { %2839 = vmatmul.mubr.msk.f32.gmra.mrb[56].mxu1 %vm856_vm4, %v5433_v11 }
 0x2bf   :  { %2137 = vmatmul.mubr.f32.gmra.mrb[16].mxu0 %v1639_v61  ;;  %2841 = vmatprep.mubr.msk.f32.mxu1 %vm3922_vm12, %v6527_v9 }
 0x2c0   :  { %2142 = vmatprep.mubr.f32.mxu0 %v1645_v58 }
 0x2c2   :  { %2842 = vmatmul.mubr.msk.f32.gmra.mrb[58].mxu1 %vm856_vm4, %v5473_v44 }
 0x2c3   :  { %2143 = vmatmul.mubr.f32.gmra.mrb[18].mxu0 %v1644_v25  ;;  %2844 = vmatprep.mubr.msk.f32.mxu1 %vm3922_vm12, %v6527_v9 }
 0x2c6   :  { %2845 = vmatmul.mubr.msk.f32.gmra.mrb[60].mxu1 %vm856_vm4, %v5532_v53 }
 0x316   :  { %v6099_v36 = vpop.f32.mrb[6].mxu1 }
 0x317   :  { %v6101_v2 = vpop.f32.mrb[7].mxu1 }
 0x31b   :  { %v6103_v28 = vpop.f32.mrb[8].mxu1 }
 0x31c   :  { %v6105_v11 = vpop.f32.mrb[9].mxu1 }
 0x320   :  { %v6107_v49 = vpop.f32.mrb[10].mxu1 }
 0x321   :  { %v6109_v23 = vpop.f32.mrb[11].mxu1 }
 0x325   :  { %v6111_v4 = vpop.f32.mrb[12].mxu1 }
 0x326   :  { %v6113_v44 = vpop.f32.mrb[13].mxu1 }
 0x329   :  { %v6115_v9 = vpop.f32.mrb[14].mxu1 }
 0x32a   :  { %v6117_v63 = vpop.f32.mrb[15].mxu1 }
 0x32d   :  { %v6119_v53 = vpop.f32.mrb[16].mxu1 }
 0x32e   :  { %v6121_v29 = vpop.f32.mrb[17].mxu1 }
 0x331   :  { %v6123_v15 = vpop.f32.mrb[18].mxu1 }
 0x332   :  { %v6125_v42 = vpop.f32.mrb[19].mxu1 }
 0x340   :  { %v2712_v59 = vpop.f32.mrb[20].mxu1 }
 0x341   :  { %v2713_v41 = vpop.f32.mrb[21].mxu1 }
 0x342   :  { %v2714_v26 = vadd.f32 %v2713_v41, %v2712_v59 }
 0x344   :  { %v2715_v18 = vpop.f32.mrb[22].mxu1  ;;  %v2323_v61 = vadd.f32 %v2714_v26, %v1882_v0  ;;  %v6139_v26 = vpop.permute.xlu0 %1906 }
 0x345   :  { %v2716_v1 = vpop.f32.mrb[23].mxu1 }
 0x346   :  { %v2717_v56 = vadd.f32 %v2716_v1, %v2715_v18 }
 0x348   :  { %v2718_v20 = vpop.f32.mrb[24].mxu1  ;;  %v2328_v21 = vadd.f32 %v2717_v56, %v1887_v39 }
 0x349   :  { %v2719_v14 = vpop.f32.mrb[25].mxu1 }
 0x34a   :  { %v2720_v40 = vadd.f32 %v2719_v14, %v2718_v20 }
 0x34c   :  { %v2721_v62 = vpop.f32.mrb[26].mxu1  ;;  %v2333_v10 = vadd.f32 %v2720_v40, %v1892_v54  ;;  %v6144_v40 = vpop.permute.xlu1 %1911 }
 0x34d   :  { %v2722_v8 = vpop.f32.mrb[27].mxu1 }
 0x34e   :  { %v2723_v46 = vadd.f32 %v2722_v8, %v2721_v62 }
 0x350   :  { %v2338_v6 = vadd.f32 %v2723_v46, %v6129_v51 }
 0x351   :  { %v2724_v48 = vpop.f32.mrb[28].mxu1 }
 0x352   :  { %v2725_v34 = vpop.f32.mrb[29].mxu1 }
 0x353   :  { %v2726_v32 = vadd.f32 %v2725_v34, %v2724_v48 }
 0x355   :  { %v2343_v13 = vadd.f32 %v2726_v32, %v6134_v33 }
 0x356   :  { %v2727_v57 = vpop.f32.mrb[30].mxu1 }
 0x357   :  { %v2728_v16 = vpop.f32.mrb[31].mxu1 }
 0x358   :  { %v2729_v38 = vadd.f32 %v2728_v16, %v2727_v57 }
 0x35a   :  { %v2730_v3 = vpop.f32.mrb[32].mxu1  ;;  %v2348_v1 = vadd.f32 %v2729_v38, %v6139_v26 }
 0x35b   :  { %v2731_v35 = vpop.f32.mrb[33].mxu1 }
 0x35c   :  { %v2732_v52 = vadd.f32 %v2731_v35, %v2730_v3 }
 0x35e   :  { %v2353_v8 = vadd.f32 %v2732_v52, %v6144_v40 }
 0x362   :  { %v2765_v17 = vpop.f32.mrb[34].mxu1 }
 0x363   :  { %v2766_v27 = vpop.f32.mrb[35].mxu1 }
 0x364   :  { %v2767_v37 = vadd.f32 %v2766_v27, %v2765_v17 }
 0x366   :  { %v2768_v5 = vpop.f32.mrb[36].mxu1  ;;  %v2423_v58 = vadd.f32 %v2767_v37, %v2323_v61 }
 0x367   :  { %v2769_v22 = vpop.f32.mrb[37].mxu1 }
 0x368   :  { %v2770_v47 = vadd.f32 %v2769_v22, %v2768_v5 }
 0x36a   :  { %v2771_v7 = vpop.f32.mrb[38].mxu1  ;;  %v2428_v60 = vadd.f32 %v2770_v47, %v2328_v21 }
 0x36b   :  { %v2772_v25 = vpop.f32.mrb[39].mxu1 }
 0x36c   :  { %v2773_v19 = vadd.f32 %v2772_v25, %v2771_v7 }
 0x36e   :  { %v2774_v50 = vpop.f32.mrb[40].mxu1  ;;  %v6127_v31 = vadd.f32 %v2773_v19, %v2333_v10 }
 0x36f   :  { %v2775_v45 = vpop.f32.mrb[41].mxu1 }
 0x370   :  { %v2776_v43 = vadd.f32 %v2775_v45, %v2774_v50 }
 0x372   :  { %v2777_v55 = vpop.f32.mrb[42].mxu1  ;;  %v6132_v12 = vadd.f32 %v2776_v43, %v2338_v6 }
 0x373   :  { %v2778_v24 = vpop.f32.mrb[43].mxu1 }
 0x374   :  { %v2779_v30 = vadd.f32 %v2778_v24, %v2777_v55 }
 0x376   :  { %v2780_v59 = vpop.f32.mrb[44].mxu1  ;;  %v6137_v41 = vadd.f32 %v2779_v30, %v2343_v13 }
 0x377   :  { %v2781_v18 = vpop.f32.mrb[45].mxu1 }
 0x378   :  { %v2782_v56 = vadd.f32 %v2781_v18, %v2780_v59 }
 0x37a   :  { %v2783_v20 = vpop.f32.mrb[46].mxu1  ;;  %v6142_v14 = vadd.f32 %v2782_v56, %v2348_v1 }
 0x37b   :  { %v2784_v62 = vpop.f32.mrb[47].mxu1 }
 0x37c   :  { %v2785_v46 = vadd.f32 %v2784_v62, %v2783_v20 }
 0x37e   :  { %v2108_v48 = vpop.f32.mrb[6].mxu0  ;;  %v6147_v16 = vadd.f32 %v2785_v46, %v2353_v8 }
 0x37f   :  { %v3118_v34 = vadd.f32 %v2108_v48, %v1882_v0  ;;  %v2110_v32 = vpop.f32.mrb[7].mxu0 }
 0x380   :  { %v3120_v57 = vadd.f32 %v2110_v32, %v1882_v0 }
 0x381   :  { %v3119_v3 = vadd.f32 %v3118_v34, %v6099_v36  ;;  %v2522_v37 = vpop.f32.mrb[48].mxu1 }
 0x382   :  { %v3121_v38 = vadd.f32 %v3120_v57, %v6101_v2  ;;  %v2114_v35 = vpop.f32.mrb[8].mxu0  ;;  %v2523_v21 = vadd.f32 %v2522_v37, %v2423_v58  ;;  %v2828_v52 = vpop.f32.mrb[49].mxu1 }
 0x383   :  { %v2659_v17 = vadd.f32 -11.0, %v3119_v3  ;;  %v3122_v27 = vadd.f32 %v2114_v35, %v1887_v39  ;;  %v2116_v61 = vpop.f32.mrb[9].mxu0 }
 0x384   :  { %v2660_v5 = vadd.f32 -11.0, %v3121_v38  ;;  %v3124_v22 = vadd.f32 %v2116_v61, %v1887_v39  ;;  %v2661_v10 = vadd.f32 -11.0, %v2523_v21 }
 0x385   :  { %v2577_v47 = vmax.f32 %v2659_v17, 0.0  ;;  %v3123_v7 = vadd.f32 %v3122_v27, %v6103_v28  ;;  %v2527_v45 = vpop.f32.mrb[50].mxu1 }
 0x386   :  { %v2578_v25 = vmax.f32 %v2660_v5, 0.0  ;;  %v3125_v0 = vadd.f32 %v3124_v22, %v6105_v11  ;;  %v2120_v19 = vpop.f32.mrb[10].mxu0  ;;  %v2579_v39 = vmax.f32 %v2661_v10, 0.0  ;;  %v2528_v6 = vadd.f32 %v2527_v45, %v2428_v60  ;;  %v2831_v43 = vpop.f32.mrb[51].mxu1 }
 0x387   :  { %2598 = vst [vmem:[%s6245_s6] sm:$0xff] %v2577_v47  ;;  %v2662_v36 = vadd.f32 -11.0, %v3123_v7  ;;  %v3126_v2 = vadd.f32 %v2120_v19, %v1892_v54  ;;  %v2122_v50 = vpop.f32.mrb[11].mxu0 }
 0x388   :  { %2599 = vst [vmem:[%s6245_s6 + $0x8] sm:$0xff] %v2578_v25  ;;  %v2663_v58 = vadd.f32 -11.0, %v3125_v0  ;;  %v3128_v28 = vadd.f32 %v2122_v50, %v1892_v54  ;;  %2600 = vst [vmem:[%s6245_s6 + $0x10] sm:$0xff] %v2579_v39  ;;  %v2664_v30 = vadd.f32 -11.0, %v2528_v6 }
 0x389   :  { %v2580_v11 = vmax.f32 %v2662_v36, 0.0  ;;  %v3127_v55 = vadd.f32 %v3126_v2, %v6107_v49  ;;  %v2532_v1 = vpop.f32.mrb[52].mxu1 }
 0x38a   :  { %v2581_v24 = vmax.f32 %v2663_v58, 0.0  ;;  %v3129_v13 = vadd.f32 %v3128_v28, %v6109_v23  ;;  %v2126_v59 = vpop.f32.mrb[12].mxu0  ;;  %v2582_v56 = vmax.f32 %v2664_v30, 0.0  ;;  %v2533_v23 = vadd.f32 %v2532_v1, %v6127_v31  ;;  %v2834_v62 = vpop.f32.mrb[53].mxu1 }
 0x38b   :  { %2601 = vst [vmem:[%s6245_s6 + $0x18] sm:$0xff] %v2580_v11  ;;  %v2665_v18 = vadd.f32 -11.0, %v3127_v55  ;;  %v3130_v60 = vadd.f32 %v2126_v59, %v6129_v51  ;;  %v2128_v54 = vpop.f32.mrb[13].mxu0 }
 0x38c   :  { %2602 = vst [vmem:[%s6245_s6 + $0x20] sm:$0xff] %v2581_v24  ;;  %v2666_v49 = vadd.f32 -11.0, %v3129_v13  ;;  %v3132_v20 = vadd.f32 %v2128_v54, %v6129_v51  ;;  %2603 = vst [vmem:[%s6245_s6 + $0x28] sm:$0xff] %v2582_v56  ;;  %v2667_v32 = vadd.f32 -11.0, %v2533_v23 }
 0x38d   :  { %v2583_v8 = vmax.f32 %v2665_v18, 0.0  ;;  %v3131_v46 = vadd.f32 %v3130_v60, %v6111_v4  ;;  %v2537_v38 = vpop.f32.mrb[54].mxu1 }
 0x38e   :  { %v2584_v48 = vmax.f32 %v2666_v49, 0.0  ;;  %v3133_v34 = vadd.f32 %v3132_v20, %v6113_v44  ;;  %v2132_v57 = vpop.f32.mrb[14].mxu0  ;;  %v2585_v35 = vmax.f32 %v2667_v32, 0.0  ;;  %v2538_v44 = vadd.f32 %v2537_v38, %v6132_v12  ;;  %v2837_v27 = vpop.f32.mrb[55].mxu1 }
 0x38f   :  { %2604 = vst [vmem:[%s6245_s6 + $0x30] sm:$0xff] %v2583_v8  ;;  %v2668_v51 = vadd.f32 -11.0, %v3131_v46  ;;  %v3134_v31 = vadd.f32 %v2132_v57, %v6134_v33  ;;  %v2134_v3 = vpop.f32.mrb[15].mxu0 }
 0x390   :  { %2605 = vst [vmem:[%s6245_s6 + $0x38] sm:$0xff] %v2584_v48  ;;  %v2669_v4 = vadd.f32 -11.0, %v3133_v34  ;;  %v3136_v17 = vadd.f32 %v2134_v3, %v6134_v33  ;;  %2606 = vst [vmem:[%s6245_s6 + $0x40] sm:$0xff] %v2585_v35  ;;  %v2670_v21 = vadd.f32 -11.0, %v2538_v44 }
 0x391   :  { %v2586_v61 = vmax.f32 %v2668_v51, 0.0  ;;  %v3135_v37 = vadd.f32 %v3134_v31, %v6115_v9  ;;  %v2542_v7 = vpop.f32.mrb[56].mxu1 }
 0x392   :  { %v2587_v5 = vmax.f32 %v2669_v4, 0.0  ;;  %v3137_v22 = vadd.f32 %v3136_v17, %v6117_v63  ;;  %v2138_v52 = vpop.f32.mrb[16].mxu0  ;;  %v2588_v25 = vmax.f32 %v2670_v21, 0.0  ;;  %v2543_v63 = vadd.f32 %v2542_v7, %v6137_v41  ;;  %v2840_v10 = vpop.f32.mrb[57].mxu1 }
 0x393   :  { %2607 = vst [vmem:[%s6245_s6 + $0x48] sm:$0xff] %v2586_v61  ;;  %v2671_v33 = vadd.f32 -11.0, %v3135_v37  ;;  %v3138_v12 = vadd.f32 %v2138_v52, %v6139_v26  ;;  %v2140_v47 = vpop.f32.mrb[17].mxu0 }
 0x394   :  { %2608 = vst [vmem:[%s6245_s6 + $0x50] sm:$0xff] %v2587_v5  ;;  %v2672_v9 = vadd.f32 -11.0, %v3137_v22  ;;  %v3140_v0 = vadd.f32 %v2140_v47, %v6139_v26  ;;  %2609 = vst [vmem:[%s6245_s6 + $0x58] sm:$0xff] %v2588_v25  ;;  %v2673_v45 = vadd.f32 -11.0, %v2543_v63 }
 0x395   :  { %v2589_v19 = vmax.f32 %v2671_v33, 0.0  ;;  %v3139_v36 = vadd.f32 %v3138_v12, %v6119_v53  ;;  %v2547_v28 = vpop.f32.mrb[58].mxu1 }
 0x396   :  { %v2590_v2 = vmax.f32 %v2672_v9, 0.0  ;;  %v3141_v50 = vadd.f32 %v3140_v0, %v6121_v29  ;;  %v2144_v58 = vpop.f32.mrb[18].mxu0  ;;  %v2591_v6 = vmax.f32 %v2673_v45, 0.0  ;;  %v2548_v29 = vadd.f32 %v2547_v28, %v6142_v14  ;;  %v2843_v11 = vpop.f32.mrb[59].mxu1 }
 0x397   :  { %2610 = vst [vmem:[%s6245_s6 + $0x60] sm:$0xff] %v2589_v19  ;;  %v2674_v26 = vadd.f32 -11.0, %v3139_v36  ;;  %v3142_v41 = vadd.f32 %v2144_v58, %v6144_v40  ;;  %v2146_v39 = vpop.f32.mrb[19].mxu0 }
 0x398   :  { %2611 = vst [vmem:[%s6245_s6 + $0x68] sm:$0xff] %v2590_v2  ;;  %v2675_v53 = vadd.f32 -11.0, %v3141_v50  ;;  %v3144_v43 = vadd.f32 %v2146_v39, %v6144_v40  ;;  %2612 = vst [vmem:[%s6245_s6 + $0x70] sm:$0xff] %v2591_v6  ;;  %v2676_v59 = vadd.f32 -11.0, %v2548_v29 }
 0x399   :  { %v2592_v55 = vmax.f32 %v2674_v26, 0.0  ;;  %v3143_v24 = vadd.f32 %v3142_v41, %v6123_v15  ;;  %v2552_v40 = vpop.f32.mrb[60].mxu1 }
 0x39a   :  { %v2593_v13 = vmax.f32 %v2675_v53, 0.0  ;;  %v3145_v30 = vadd.f32 %v3144_v43, %v6125_v42  ;;  %v2594_v15 = vmax.f32 %v2676_v59, 0.0  ;;  %v2553_v60 = vadd.f32 %v2552_v40, %v6147_v16  ;;  %v2846_v54 = vpop.f32.mrb[61].mxu1 }
 0x39b   :  { %2613 = vst [vmem:[%s6245_s6 + $0x78] sm:$0xff] %v2592_v55  ;;  %v2677_v18 = vadd.f32 -11.0, %v3143_v24 }
 0x39c   :  { %2614 = vst [vmem:[%s6245_s6 + $0x80] sm:$0xff] %v2593_v13  ;;  %v2678_v14 = vadd.f32 -11.0, %v3145_v30  ;;  %2615 = vst [vmem:[%s6245_s6 + $0x88] sm:$0xff] %v2594_v15  ;;  %v2679_v42 = vadd.f32 -11.0, %v2553_v60 }
 0x39d   :  { %v2595_v1 = vmax.f32 %v2677_v18, 0.0 }
 0x39e   :  { %v2596_v49 = vmax.f32 %v2678_v14, 0.0  ;;  %v2597_v56 = vmax.f32 %v2679_v42, 0.0 }
 0x39f   :  { %2616 = vst [vmem:[%s6245_s6 + $0x90] sm:$0x3] %v2595_v1 }
 0x3a0   :  { %2617 = vst [vmem:[%s6245_s6 + $0x98] sm:$0x3] %v2596_v49  ;;  %2618 = vst [vmem:[%s6245_s6 + $0xa0] sm:$0x3] %v2597_v56 }

</bundles_post_ra>
